<compile_context>
chip_gen: v7x
topology: tpu7x:2x2x1
jax: 0.10.0
libtpu: 0.0.40
codegen_flags: <defaults>
</compile_context>

<pallas_src>
import math

import jax
import jax.numpy as jnp
from jax.experimental import pallas as pl
from jax.experimental.pallas import tpu as pltpu

# ----------------------- model config (from the PyTorch __init__) -----------------------
IN_CHANNELS = 4        # in_channels
OUT_CHANNELS = 32      # out_channels == transformer d_model (divisible by nhead=8)
N_LEN_SEG = 32         # n_len_seg  (>= conv kernel size 16)
N_CLASSES = 5
N_HEADS = 8
DIM_FF = 128
CONV_K = 16
CONV_STRIDE = 2
LN_EPS = 1e-5
MASK_NEG = -1e30       # additive mask value for cross-segment attention entries
MAX_BLOCK_ROWS = 256   # cap on (segments_per_block * n_samples): keeps (R, R) score mats small


def _layernorm(x, gamma, beta):
    mu = jnp.mean(x, axis=-1, keepdims=True)
    var = jnp.mean(jnp.square(x - mu), axis=-1, keepdims=True)
    return (x - mu) * jax.lax.rsqrt(var + LN_EPS) * gamma + beta


# =====================================================================================
# Fused kernel: folded conv+mean -> TransformerEncoderLayer -> segment-mean -> dense.
# One grid step processes a whole block of segments (all of them at the demo sizes).
# =====================================================================================
def fused_cnn_transformer_kernel(
        x_ref, weff_ref, bc_ref,                                   # folded Conv1d + time-mean
        wqkv_ref, bqkv_ref, wo_ref, bo_ref,                        # self-attention
        g1_ref, be1_ref, w1_ref, b1_ref, w2_ref, b2_ref,           # norm1 + FFN
        g2_ref, be2_ref,                                           # norm2
        wd_ref, bd_ref,                                            # final dense
        amask_ref, pool_ref,                                       # attn mask / pooling matrix
        out_ref, acc_ref):
    blk = pl.program_id(0)
    n_blk = pl.num_programs(0)

    @pl.when(blk == 0)
    def _init():
        acc_ref[...] = jnp.zeros_like(acc_ref)

    # ---- stage 1: folded Conv1d + mean -> one MXU matmul for all segments in this block ----
    # x_ref: (R, C*Lseg) bf16, R = segs_per_block * n_samples (segment-major rows)
    z = jnp.dot(x_ref[...], weff_ref[...], preferred_element_type=jnp.float32) + bc_ref[...]
    R, E = z.shape
    hd = E // N_HEADS
    scale = 1.0 / math.sqrt(hd)

    # ---- stage 2: post-norm TransformerEncoderLayer (dropout == identity in eval mode) ----
    qkv = (jnp.dot(z.astype(jnp.bfloat16), wqkv_ref[...],
                   preferred_element_type=jnp.float32) + bqkv_ref[...])         # (R, 3E) f32
    q = qkv[:, :E] * scale
    k = qkv[:, E:2 * E]
    v = qkv[:, 2 * E:]

    # Attention mixes across the n_samples axis only within the same segment; batching all
    # segments into one (R, R) score matrix per head (with an additive block-diagonal mask)
    # keeps every matmul wide and avoids per-segment 4-row MXU pushes.
    amask = amask_ref[...]                                                       # (R, R) f32
    ctx_heads = []
    for h in range(N_HEADS):                                                     # static unroll
        qh = q[:, h * hd:(h + 1) * hd]
        kh = k[:, h * hd:(h + 1) * hd]
        vh = v[:, h * hd:(h + 1) * hd]
        sc = jax.lax.dot_general(qh, kh, (((1,), (1,)), ((), ())),
                                 preferred_element_type=jnp.float32) + amask     # (R, R)
        sc = sc - jnp.max(sc, axis=-1, keepdims=True)
        p = jnp.exp(sc)                                    # masked entries underflow to exactly 0
        p = p * pl.reciprocal(jnp.sum(p, axis=-1, keepdims=True), approx=True)
        ctx_heads.append(jnp.dot(p, vh, preferred_element_type=jnp.float32))      # (R, hd)
    ctx = jnp.concatenate(ctx_heads, axis=-1)              # (R, E): stays in vregs, no scratch

    attn = (jnp.dot(ctx.astype(jnp.bfloat16), wo_ref[...],
                    preferred_element_type=jnp.float32) + bo_ref[...])
    x1 = _layernorm(z + attn, g1_ref[...], be1_ref[...])
    h1 = jnp.maximum(
        jnp.dot(x1.astype(jnp.bfloat16), w1_ref[...],
                preferred_element_type=jnp.float32) + b1_ref[...], 0.0)
    ff = (jnp.dot(h1.astype(jnp.bfloat16), w2_ref[...],
                  preferred_element_type=jnp.float32) + b2_ref[...])
    x2 = _layernorm(x1 + ff, g2_ref[...], be2_ref[...])

    # ---- per-sample running segment mean: pool[n, r] = 1/n_seg iff row r belongs to sample n ----
    acc_ref[...] += jnp.dot(pool_ref[...], x2, preferred_element_type=jnp.float32)

    # TODO(synk): for very large n_seg on v7x, emit per-block partial logits and mark the grid
    # axis "parallel" so both TensorCores share the segment reduction.
    @pl.when(blk == n_blk - 1)
    def _finalize():
        out_ref[...] = (jnp.dot(acc_ref[...].astype(jnp.bfloat16), wd_ref[...],
                                preferred_element_type=jnp.float32) + bd_ref[...])


# =====================================================================================
# Wrapper
# =====================================================================================
def _segments_per_block(n_seg, n_samples):
    seg_blk = n_seg
    if n_seg * n_samples > MAX_BLOCK_ROWS:
        for d in range(n_seg - 1, 0, -1):
            if (n_seg % d == 0 and d * n_samples <= MAX_BLOCK_ROWS
                    and (d * n_samples) % 8 == 0):
                seg_blk = d
                break
    return seg_blk


def cnn_transformer_forward(x, params, n_len_seg=N_LEN_SEG):
    N, C, L = x.shape
    assert L % n_len_seg == 0, "Input n_length should divided by n_len_seg"
    n_seg = L // n_len_seg
    E = OUT_CHANNELS
    CL = C * n_len_seg

    # segment-major token matrix: x2d[s*N + n, c*Lseg + p] = x[n, c, s*Lseg + p]
    # (replaces the PyTorch permute/reshape/permute chain; single layout pass, no later transpose)
    x2d = (x.reshape(N, C, n_seg, n_len_seg).transpose(2, 0, 1, 3)
             .reshape(n_seg * N, CL).astype(jnp.bfloat16))

    # fold conv + time-mean into one (C*Lseg, E) matrix:
    #   W_eff[c*Lseg + p, f] = (1/Lout) * sum_{t,k : t*stride + k == p} conv_w[c, k, f]
    Lout = (n_len_seg - CONV_K) // CONV_STRIDE + 1
    pos = jnp.arange(Lout)[:, None] * CONV_STRIDE + jnp.arange(CONV_K)[None, :]      # (Lout, K)
    coeff = (pos[..., None] == jnp.arange(n_len_seg)[None, None, :]).astype(jnp.float32)
    coeff = coeff.sum(0) / Lout                                                        # (K, Lseg)
    w_eff = jnp.einsum("ckf,kp->cpf", params["conv_w"], coeff).reshape(CL, E)

    seg_blk = _segments_per_block(n_seg, N)
    n_blk = n_seg // seg_blk
    R = seg_blk * N

    # host-built constants (hoisted out of the kernel): block-diagonal additive attention mask
    # and the segment-pooling selection matrix (segment-mean weight 1/n_seg folded in).
    r = jnp.arange(R)
    amask = jnp.where((r[:, None] // N) == (r[None, :] // N), 0.0, MASK_NEG).astype(jnp.float32)
    pool = ((r[None, :] % N) == jnp.arange(N)[:, None]).astype(jnp.float32) / n_seg    # (N, R)

    bf = lambda a: a.astype(jnp.bfloat16)
    args = (x2d, bf(w_eff), params["conv_b"],
            bf(params["wqkv"]), params["bqkv"], bf(params["wo"]), params["bo"],
            params["ln1_g"], params["ln1_b"], bf(params["w1"]), params["b1"],
            bf(params["w2"]), params["b2"], params["ln2_g"], params["ln2_b"],
            bf(params["wd"]), params["bd"], amask, pool)

    in_specs = ([pl.BlockSpec((R, CL), lambda i: (i, 0))]                 # segment-block of rows
                + [pl.BlockSpec(a.shape, lambda i: (0, 0)) for a in args[1:]])   # resident

    return pl.pallas_call(
        fused_cnn_transformer_kernel,
        out_shape=jax.ShapeDtypeStruct((N, N_CLASSES), jnp.float32),
        grid_spec=pltpu.PrefetchScalarGridSpec(
            num_scalar_prefetch=0,
            grid=(n_blk,),
            in_specs=in_specs,
            out_specs=pl.BlockSpec((N, N_CLASSES), lambda i: (0, 0)),
            scratch_shapes=[pltpu.VMEM((N, E), jnp.float32)],             # segment-mean accum
        ),
        compiler_params=pltpu.CompilerParams(
            dimension_semantics=("arbitrary",)),
    )(*args)


# =====================================================================================
# Deterministic parameter init (shapes from the PyTorch __init__); all stored in f32.
# =====================================================================================
def init_params(key):
    E, C = OUT_CHANNELS, IN_CHANNELS
    ks = jax.random.split(key, 12)
    s = 0.1
    conv_w_pt = jax.random.normal(ks[0], (E, C, CONV_K), jnp.float32) * s   # torch (F, C, K)
    conv_b = jax.random.normal(ks[1], (1, E), jnp.float32) * s
    in_proj_w = jax.random.normal(ks[2], (3 * E, E), jnp.float32) * s       # torch (3E, E)
    in_proj_b = jax.random.normal(ks[3], (1, 3 * E), jnp.float32) * s
    out_proj_w = jax.random.normal(ks[4], (E, E), jnp.float32) * s
    out_proj_b = jax.random.normal(ks[5], (1, E), jnp.float32) * s
    w1 = jax.random.normal(ks[6], (DIM_FF, E), jnp.float32) * s             # torch (128, E)
    b1 = jax.random.normal(ks[7], (1, DIM_FF), jnp.float32) * s
    w2 = jax.random.normal(ks[8], (E, DIM_FF), jnp.float32) * s             # torch (E, 128)
    b2 = jax.random.normal(ks[9], (1, E), jnp.float32) * s
    wd = jax.random.normal(ks[10], (N_CLASSES, E), jnp.float32) * s         # torch (n_classes, E)
    bd = jax.random.normal(ks[11], (1, N_CLASSES), jnp.float32) * s
    return dict(
        conv_w=jnp.transpose(conv_w_pt, (1, 2, 0)),   # (C, K, F) kernel layout
        conv_b=conv_b,
        wqkv=in_proj_w.T, bqkv=in_proj_b,
        wo=out_proj_w.T, bo=out_proj_b,
        ln1_g=jnp.ones((1, E), jnp.float32), ln1_b=jnp.zeros((1, E), jnp.float32),
        w1=w1.T, b1=b1, w2=w2.T, b2=b2,
        ln2_g=jnp.ones((1, E), jnp.float32), ln2_b=jnp.zeros((1, E), jnp.float32),
        wd=wd.T, bd=bd,
    )


# =====================================================================================
# Pure-JAX f32 reference (same math as the PyTorch forward, eval mode)
# =====================================================================================
def reference_forward(x, params, n_len_seg=N_LEN_SEG):
    N, C, L = x.shape
    n_seg = L // n_len_seg
    E = OUT_CHANNELS
    hd = E // N_HEADS

    xs = jnp.transpose(x, (0, 2, 1)).reshape(N * n_seg, n_len_seg, C)
    xs = jnp.transpose(xs, (0, 2, 1))
    w_pt = jnp.transpose(params["conv_w"], (2, 0, 1))                    # (F, C, K)
    conv = jax.lax.conv_general_dilated(xs, w_pt, (CONV_STRIDE,), "VALID",
                                        dimension_numbers=("NCH", "OIH", "NCH"))
    conv = conv + params["conv_b"].reshape(1, E, 1)
    feat = conv.mean(-1)
    z = feat.reshape(N, n_seg, E)

    qkv = jnp.einsum("nse,ef->nsf", z, params["wqkv"]) + params["bqkv"][0]
    q, k, v = qkv[..., :E], qkv[..., E:2 * E], qkv[..., 2 * E:]
    qh = q.reshape(N, n_seg, N_HEADS, hd)
    kh = k.reshape(N, n_seg, N_HEADS, hd)
    vh = v.reshape(N, n_seg, N_HEADS, hd)
    sc = jnp.einsum("nshd,mshd->shnm", qh, kh) / math.sqrt(hd)
    p = jax.nn.softmax(sc, axis=-1)
    oh = jnp.einsum("shnm,mshd->nshd", p, vh).reshape(N, n_seg, E)
    attn = jnp.einsum("nse,ef->nsf", oh, params["wo"]) + params["bo"][0]

    def ln(xx, g, b):
        mu = xx.mean(-1, keepdims=True)
        var = ((xx - mu) ** 2).mean(-1, keepdims=True)
        return (xx - mu) * jax.lax.rsqrt(var + LN_EPS) * g[0] + b[0]

    x1 = ln(z + attn, params["ln1_g"], params["ln1_b"])
    h1 = jax.nn.relu(jnp.einsum("nse,ef->nsf", x1, params["w1"]) + params["b1"][0])
    ff = jnp.einsum("nsf,fe->nse", h1, params["w2"]) + params["b2"][0]
    x2 = ln(x1 + ff, params["ln2_g"], params["ln2_b"])
    pooled = x2.mean(1)
    return pooled @ params["wd"] + params["bd"][0]


if __name__ == "__main__":
    key = jax.random.PRNGKey(0)
    k_x, k_p = jax.random.split(key)
    N_SAMPLES, N_LENGTH = 4, 256                     # n_seg = 256 // 32 = 8, block rows = 32
    x = jax.random.normal(k_x, (N_SAMPLES, IN_CHANNELS, N_LENGTH), jnp.float32)
    params = init_params(k_p)

    fwd = jax.jit(cnn_transformer_forward)
    out = jax.block_until_ready(fwd(x, params))

    ref = reference_forward(x, params)
    err = float(jnp.max(jnp.abs(out - ref)))
    if not bool(jnp.isfinite(out).all()) or err > 5e-2:
        raise AssertionError(f"Pallas output mismatch vs reference: max abs err {err}")
    print("KERNEL_OK")
</pallas_src>

<mosaic_0001>
module attributes {stable_mosaic.version = 11 : i64} {
  func.func @fused_cnn_transformer_kernel(%arg0: i32, %arg1: memref<32x128xbf16, #tpu.memory_space<vmem>>, %arg2: memref<128x32xbf16, #tpu.memory_space<vmem>>, %arg3: memref<1x32xf32, #tpu.memory_space<vmem>>, %arg4: memref<32x96xbf16, #tpu.memory_space<vmem>>, %arg5: memref<1x96xf32, #tpu.memory_space<vmem>>, %arg6: memref<32x32xbf16, #tpu.memory_space<vmem>>, %arg7: memref<1x32xf32, #tpu.memory_space<vmem>>, %arg8: memref<1x32xf32, #tpu.memory_space<vmem>>, %arg9: memref<1x32xf32, #tpu.memory_space<vmem>>, %arg10: memref<32x128xbf16, #tpu.memory_space<vmem>>, %arg11: memref<1x128xf32, #tpu.memory_space<vmem>>, %arg12: memref<128x32xbf16, #tpu.memory_space<vmem>>, %arg13: memref<1x32xf32, #tpu.memory_space<vmem>>, %arg14: memref<1x32xf32, #tpu.memory_space<vmem>>, %arg15: memref<1x32xf32, #tpu.memory_space<vmem>>, %arg16: memref<32x5xbf16, #tpu.memory_space<vmem>>, %arg17: memref<1x5xf32, #tpu.memory_space<vmem>>, %arg18: memref<32x32xf32, #tpu.memory_space<vmem>>, %arg19: memref<4x32xf32, #tpu.memory_space<vmem>>, %arg20: memref<4x5xf32, #tpu.memory_space<vmem>>, %arg21: memref<4x32xf32, #tpu.memory_space<vmem>>) attributes {dimension_semantics = [#tpu.dimension_semantics<arbitrary>], iteration_bounds = array<i64: 1>, scalar_prefetch = 0 : i64, scratch_operands = 1 : i64, tpu.core_type = #tpu.core_type<tc>, window_params = [{transform_indices = @transform_0, window_bounds = array<i64: 32, 128>}, {pipeline_mode = #tpu.pipeline_mode<synchronous>, transform_indices = @transform_1, window_bounds = array<i64: 128, 32>}, {pipeline_mode = #tpu.pipeline_mode<synchronous>, transform_indices = @transform_2, window_bounds = array<i64: 1, 32>}, {pipeline_mode = #tpu.pipeline_mode<synchronous>, transform_indices = @transform_3, window_bounds = array<i64: 32, 96>}, {pipeline_mode = #tpu.pipeline_mode<synchronous>, transform_indices = @transform_4, window_bounds = array<i64: 1, 96>}, {pipeline_mode = #tpu.pipeline_mode<synchronous>, transform_indices = @transform_5, window_bounds = array<i64: 32, 32>}, {pipeline_mode = #tpu.pipeline_mode<synchronous>, transform_indices = @transform_6, window_bounds = array<i64: 1, 32>}, {pipeline_mode = #tpu.pipeline_mode<synchronous>, transform_indices = @transform_7, window_bounds = array<i64: 1, 32>}, {pipeline_mode = #tpu.pipeline_mode<synchronous>, transform_indices = @transform_8, window_bounds = array<i64: 1, 32>}, {pipeline_mode = #tpu.pipeline_mode<synchronous>, transform_indices = @transform_9, window_bounds = array<i64: 32, 128>}, {pipeline_mode = #tpu.pipeline_mode<synchronous>, transform_indices = @transform_10, window_bounds = array<i64: 1, 128>}, {pipeline_mode = #tpu.pipeline_mode<synchronous>, transform_indices = @transform_11, window_bounds = array<i64: 128, 32>}, {pipeline_mode = #tpu.pipeline_mode<synchronous>, transform_indices = @transform_12, window_bounds = array<i64: 1, 32>}, {pipeline_mode = #tpu.pipeline_mode<synchronous>, transform_indices = @transform_13, window_bounds = array<i64: 1, 32>}, {pipeline_mode = #tpu.pipeline_mode<synchronous>, transform_indices = @transform_14, window_bounds = array<i64: 1, 32>}, {pipeline_mode = #tpu.pipeline_mode<synchronous>, transform_indices = @transform_15, window_bounds = array<i64: 32, 5>}, {pipeline_mode = #tpu.pipeline_mode<synchronous>, transform_indices = @transform_16, window_bounds = array<i64: 1, 5>}, {pipeline_mode = #tpu.pipeline_mode<synchronous>, transform_indices = @transform_17, window_bounds = array<i64: 32, 32>}, {pipeline_mode = #tpu.pipeline_mode<synchronous>, transform_indices = @transform_18, window_bounds = array<i64: 4, 32>}, {pipeline_mode = #tpu.pipeline_mode<synchronous>, transform_indices = @transform_19, window_bounds = array<i64: 4, 5>}]} {
    %c0_i32 = arith.constant 0 : i32
    %0 = arith.cmpi eq, %arg0, %c0_i32 : i32
    %1 = arith.extui %0 : i1 to i32
    %c0_i32_0 = arith.constant 0 : i32
    %2 = arith.cmpi ne, %1, %c0_i32_0 : i32
    scf.if %2 {
      %cst_89 = arith.constant 0.000000e+00 : f32
      %228 = vector.broadcast %cst_89 : f32 to vector<4x32xf32>
      %c0_90 = arith.constant 0 : index
      %c0_91 = arith.constant 0 : index
      %229 = vector.load %arg21[%c0_90, %c0_91] : memref<4x32xf32, #tpu.memory_space<vmem>>, vector<4x32xf32>
      tpu.vector_store %arg21[%c0_90, %c0_91], %228 {strides = array<i32>} : memref<4x32xf32, #tpu.memory_space<vmem>>, vector<4x32xf32>,
    } else {
    }
    %c0 = arith.constant 0 : index
    %c0_1 = arith.constant 0 : index
    %3 = vector.load %arg1[%c0, %c0_1] : memref<32x128xbf16, #tpu.memory_space<vmem>>, vector<32x128xbf16>
    %c0_2 = arith.constant 0 : index
    %c0_3 = arith.constant 0 : index
    %4 = vector.load %arg2[%c0_2, %c0_3] : memref<128x32xbf16, #tpu.memory_space<vmem>>, vector<128x32xbf16>
    %cst = arith.constant dense<0.000000e+00> : vector<32x32xf32>
    %5 = tpu.matmul %3, %4, %cst {dimension_numbers = #tpu.dot_dimension_numbers<[1], [0], [0], [1], [0, 0, 1, 1], [], []>} : vector<32x128xbf16>, vector<128x32xbf16>, vector<32x32xf32> -> vector<32x32xf32>
    %c0_4 = arith.constant 0 : index
    %c0_5 = arith.constant 0 : index
    %6 = vector.load %arg3[%c0_4, %c0_5] : memref<1x32xf32, #tpu.memory_space<vmem>>, vector<1x32xf32>
    %7 = vector.broadcast %6 : vector<1x32xf32> to vector<32x32xf32>
    %8 = arith.addf %5, %7 : vector<32x32xf32>
    %9 = arith.truncf %8 : vector<32x32xf32> to vector<32x32xbf16>
    %c0_6 = arith.constant 0 : index
    %c0_7 = arith.constant 0 : index
    %10 = vector.load %arg4[%c0_6, %c0_7] : memref<32x96xbf16, #tpu.memory_space<vmem>>, vector<32x96xbf16>
    %cst_8 = arith.constant dense<0.000000e+00> : vector<32x96xf32>
    %11 = tpu.matmul %9, %10, %cst_8 {dimension_numbers = #tpu.dot_dimension_numbers<[1], [0], [0], [1], [0, 0, 1, 1], [], []>} : vector<32x32xbf16>, vector<32x96xbf16>, vector<32x96xf32> -> vector<32x96xf32>
    %c0_9 = arith.constant 0 : index
    %c0_10 = arith.constant 0 : index
    %12 = vector.load %arg5[%c0_9, %c0_10] : memref<1x96xf32, #tpu.memory_space<vmem>>, vector<1x96xf32>
    %13 = vector.broadcast %12 : vector<1x96xf32> to vector<32x96xf32>
    %14 = arith.addf %11, %13 : vector<32x96xf32>
    %15 = vector.extract_strided_slice %14 {offsets = [0, 0], sizes = [32, 32], strides = [1, 1]} : vector<32x96xf32> to vector<32x32xf32>
    %cst_11 = arith.constant 5.000000e-01 : f32
    %16 = vector.broadcast %cst_11 : f32 to vector<32x32xf32>
    %17 = arith.mulf %15, %16 : vector<32x32xf32>
    %18 = vector.extract_strided_slice %14 {offsets = [0, 32], sizes = [32, 32], strides = [1, 1]} : vector<32x96xf32> to vector<32x32xf32>
    %19 = vector.extract_strided_slice %14 {offsets = [0, 64], sizes = [32, 32], strides = [1, 1]} : vector<32x96xf32> to vector<32x32xf32>
    %c0_12 = arith.constant 0 : index
    %c0_13 = arith.constant 0 : index
    %20 = vector.load %arg18[%c0_12, %c0_13] : memref<32x32xf32, #tpu.memory_space<vmem>>, vector<32x32xf32>
    %21 = vector.extract_strided_slice %17 {offsets = [0, 0], sizes = [32, 4], strides = [1, 1]} : vector<32x32xf32> to vector<32x4xf32>
    %22 = vector.extract_strided_slice %18 {offsets = [0, 0], sizes = [32, 4], strides = [1, 1]} : vector<32x32xf32> to vector<32x4xf32>
    %23 = vector.extract_strided_slice %19 {offsets = [0, 0], sizes = [32, 4], strides = [1, 1]} : vector<32x32xf32> to vector<32x4xf32>
    %cst_14 = arith.constant dense<0.000000e+00> : vector<32x32xf32>
    %24 = tpu.matmul %21, %22, %cst_14 {dimension_numbers = #tpu.dot_dimension_numbers<[1], [1], [0], [0], [0, 0, 1, 0], [], []>} : vector<32x4xf32>, vector<32x4xf32>, vector<32x32xf32> -> vector<32x32xf32>
    %25 = arith.addf %24, %20 : vector<32x32xf32>
    %cst_15 = arith.constant dense<0xFF800000> : vector<32xf32>
    %26 = vector.multi_reduction <maximumf>, %25, %cst_15 [1] : vector<32x32xf32> to vector<32xf32>
    %27 = vector.shape_cast %26 : vector<32xf32> to vector<32x1xf32>
    %28 = vector.broadcast %27 : vector<32x1xf32> to vector<32x32xf32>
    %29 = arith.subf %25, %28 : vector<32x32xf32>
    %30 = math.exp %29 : vector<32x32xf32>
    %cst_16 = arith.constant dense<0.000000e+00> : vector<32xf32>
    %31 = vector.multi_reduction <add>, %30, %cst_16 [1] : vector<32x32xf32> to vector<32xf32>
    %32 = vector.shape_cast %31 : vector<32xf32> to vector<32x1xf32>
    %33 = tpu.reciprocal %32 {approx = true} : vector<32x1xf32> -> vector<32x1xf32>
    %34 = vector.broadcast %33 : vector<32x1xf32> to vector<32x32xf32>
    %35 = arith.mulf %30, %34 : vector<32x32xf32>
    %cst_17 = arith.constant dense<0.000000e+00> : vector<32x4xf32>
    %36 = tpu.matmul %35, %23, %cst_17 {dimension_numbers = #tpu.dot_dimension_numbers<[1], [0], [0], [1], [0, 0, 1, 1], [], []>} : vector<32x32xf32>, vector<32x4xf32>, vector<32x4xf32> -> vector<32x4xf32>
    %37 = vector.extract_strided_slice %17 {offsets = [0, 4], sizes = [32, 4], strides = [1, 1]} : vector<32x32xf32> to vector<32x4xf32>
    %38 = vector.extract_strided_slice %18 {offsets = [0, 4], sizes = [32, 4], strides = [1, 1]} : vector<32x32xf32> to vector<32x4xf32>
    %39 = vector.extract_strided_slice %19 {offsets = [0, 4], sizes = [32, 4], strides = [1, 1]} : vector<32x32xf32> to vector<32x4xf32>
    %cst_18 = arith.constant dense<0.000000e+00> : vector<32x32xf32>
    %40 = tpu.matmul %37, %38, %cst_18 {dimension_numbers = #tpu.dot_dimension_numbers<[1], [1], [0], [0], [0, 0, 1, 0], [], []>} : vector<32x4xf32>, vector<32x4xf32>, vector<32x32xf32> -> vector<32x32xf32>
    %41 = arith.addf %40, %20 : vector<32x32xf32>
    %cst_19 = arith.constant dense<0xFF800000> : vector<32xf32>
    %42 = vector.multi_reduction <maximumf>, %41, %cst_19 [1] : vector<32x32xf32> to vector<32xf32>
    %43 = vector.shape_cast %42 : vector<32xf32> to vector<32x1xf32>
    %44 = vector.broadcast %43 : vector<32x1xf32> to vector<32x32xf32>
    %45 = arith.subf %41, %44 : vector<32x32xf32>
    %46 = math.exp %45 : vector<32x32xf32>
    %cst_20 = arith.constant dense<0.000000e+00> : vector<32xf32>
    %47 = vector.multi_reduction <add>, %46, %cst_20 [1] : vector<32x32xf32> to vector<32xf32>
    %48 = vector.shape_cast %47 : vector<32xf32> to vector<32x1xf32>
    %49 = tpu.reciprocal %48 {approx = true} : vector<32x1xf32> -> vector<32x1xf32>
    %50 = vector.broadcast %49 : vector<32x1xf32> to vector<32x32xf32>
    %51 = arith.mulf %46, %50 : vector<32x32xf32>
    %cst_21 = arith.constant dense<0.000000e+00> : vector<32x4xf32>
    %52 = tpu.matmul %51, %39, %cst_21 {dimension_numbers = #tpu.dot_dimension_numbers<[1], [0], [0], [1], [0, 0, 1, 1], [], []>} : vector<32x32xf32>, vector<32x4xf32>, vector<32x4xf32> -> vector<32x4xf32>
    %53 = vector.extract_strided_slice %17 {offsets = [0, 8], sizes = [32, 4], strides = [1, 1]} : vector<32x32xf32> to vector<32x4xf32>
    %54 = vector.extract_strided_slice %18 {offsets = [0, 8], sizes = [32, 4], strides = [1, 1]} : vector<32x32xf32> to vector<32x4xf32>
    %55 = vector.extract_strided_slice %19 {offsets = [0, 8], sizes = [32, 4], strides = [1, 1]} : vector<32x32xf32> to vector<32x4xf32>
    %cst_22 = arith.constant dense<0.000000e+00> : vector<32x32xf32>
    %56 = tpu.matmul %53, %54, %cst_22 {dimension_numbers = #tpu.dot_dimension_numbers<[1], [1], [0], [0], [0, 0, 1, 0], [], []>} : vector<32x4xf32>, vector<32x4xf32>, vector<32x32xf32> -> vector<32x32xf32>
    %57 = arith.addf %56, %20 : vector<32x32xf32>
    %cst_23 = arith.constant dense<0xFF800000> : vector<32xf32>
    %58 = vector.multi_reduction <maximumf>, %57, %cst_23 [1] : vector<32x32xf32> to vector<32xf32>
    %59 = vector.shape_cast %58 : vector<32xf32> to vector<32x1xf32>
    %60 = vector.broadcast %59 : vector<32x1xf32> to vector<32x32xf32>
    %61 = arith.subf %57, %60 : vector<32x32xf32>
    %62 = math.exp %61 : vector<32x32xf32>
    %cst_24 = arith.constant dense<0.000000e+00> : vector<32xf32>
    %63 = vector.multi_reduction <add>, %62, %cst_24 [1] : vector<32x32xf32> to vector<32xf32>
    %64 = vector.shape_cast %63 : vector<32xf32> to vector<32x1xf32>
    %65 = tpu.reciprocal %64 {approx = true} : vector<32x1xf32> -> vector<32x1xf32>
    %66 = vector.broadcast %65 : vector<32x1xf32> to vector<32x32xf32>
    %67 = arith.mulf %62, %66 : vector<32x32xf32>
    %cst_25 = arith.constant dense<0.000000e+00> : vector<32x4xf32>
    %68 = tpu.matmul %67, %55, %cst_25 {dimension_numbers = #tpu.dot_dimension_numbers<[1], [0], [0], [1], [0, 0, 1, 1], [], []>} : vector<32x32xf32>, vector<32x4xf32>, vector<32x4xf32> -> vector<32x4xf32>
    %69 = vector.extract_strided_slice %17 {offsets = [0, 12], sizes = [32, 4], strides = [1, 1]} : vector<32x32xf32> to vector<32x4xf32>
    %70 = vector.extract_strided_slice %18 {offsets = [0, 12], sizes = [32, 4], strides = [1, 1]} : vector<32x32xf32> to vector<32x4xf32>
    %71 = vector.extract_strided_slice %19 {offsets = [0, 12], sizes = [32, 4], strides = [1, 1]} : vector<32x32xf32> to vector<32x4xf32>
    %cst_26 = arith.constant dense<0.000000e+00> : vector<32x32xf32>
    %72 = tpu.matmul %69, %70, %cst_26 {dimension_numbers = #tpu.dot_dimension_numbers<[1], [1], [0], [0], [0, 0, 1, 0], [], []>} : vector<32x4xf32>, vector<32x4xf32>, vector<32x32xf32> -> vector<32x32xf32>
    %73 = arith.addf %72, %20 : vector<32x32xf32>
    %cst_27 = arith.constant dense<0xFF800000> : vector<32xf32>
    %74 = vector.multi_reduction <maximumf>, %73, %cst_27 [1] : vector<32x32xf32> to vector<32xf32>
    %75 = vector.shape_cast %74 : vector<32xf32> to vector<32x1xf32>
    %76 = vector.broadcast %75 : vector<32x1xf32> to vector<32x32xf32>
    %77 = arith.subf %73, %76 : vector<32x32xf32>
    %78 = math.exp %77 : vector<32x32xf32>
    %cst_28 = arith.constant dense<0.000000e+00> : vector<32xf32>
    %79 = vector.multi_reduction <add>, %78, %cst_28 [1] : vector<32x32xf32> to vector<32xf32>
    %80 = vector.shape_cast %79 : vector<32xf32> to vector<32x1xf32>
    %81 = tpu.reciprocal %80 {approx = true} : vector<32x1xf32> -> vector<32x1xf32>
    %82 = vector.broadcast %81 : vector<32x1xf32> to vector<32x32xf32>
    %83 = arith.mulf %78, %82 : vector<32x32xf32>
    %cst_29 = arith.constant dense<0.000000e+00> : vector<32x4xf32>
    %84 = tpu.matmul %83, %71, %cst_29 {dimension_numbers = #tpu.dot_dimension_numbers<[1], [0], [0], [1], [0, 0, 1, 1], [], []>} : vector<32x32xf32>, vector<32x4xf32>, vector<32x4xf32> -> vector<32x4xf32>
    %85 = vector.extract_strided_slice %17 {offsets = [0, 16], sizes = [32, 4], strides = [1, 1]} : vector<32x32xf32> to vector<32x4xf32>
    %86 = vector.extract_strided_slice %18 {offsets = [0, 16], sizes = [32, 4], strides = [1, 1]} : vector<32x32xf32> to vector<32x4xf32>
    %87 = vector.extract_strided_slice %19 {offsets = [0, 16], sizes = [32, 4], strides = [1, 1]} : vector<32x32xf32> to vector<32x4xf32>
    %cst_30 = arith.constant dense<0.000000e+00> : vector<32x32xf32>
    %88 = tpu.matmul %85, %86, %cst_30 {dimension_numbers = #tpu.dot_dimension_numbers<[1], [1], [0], [0], [0, 0, 1, 0], [], []>} : vector<32x4xf32>, vector<32x4xf32>, vector<32x32xf32> -> vector<32x32xf32>
    %89 = arith.addf %88, %20 : vector<32x32xf32>
    %cst_31 = arith.constant dense<0xFF800000> : vector<32xf32>
    %90 = vector.multi_reduction <maximumf>, %89, %cst_31 [1] : vector<32x32xf32> to vector<32xf32>
    %91 = vector.shape_cast %90 : vector<32xf32> to vector<32x1xf32>
    %92 = vector.broadcast %91 : vector<32x1xf32> to vector<32x32xf32>
    %93 = arith.subf %89, %92 : vector<32x32xf32>
    %94 = math.exp %93 : vector<32x32xf32>
    %cst_32 = arith.constant dense<0.000000e+00> : vector<32xf32>
    %95 = vector.multi_reduction <add>, %94, %cst_32 [1] : vector<32x32xf32> to vector<32xf32>
    %96 = vector.shape_cast %95 : vector<32xf32> to vector<32x1xf32>
    %97 = tpu.reciprocal %96 {approx = true} : vector<32x1xf32> -> vector<32x1xf32>
    %98 = vector.broadcast %97 : vector<32x1xf32> to vector<32x32xf32>
    %99 = arith.mulf %94, %98 : vector<32x32xf32>
    %cst_33 = arith.constant dense<0.000000e+00> : vector<32x4xf32>
    %100 = tpu.matmul %99, %87, %cst_33 {dimension_numbers = #tpu.dot_dimension_numbers<[1], [0], [0], [1], [0, 0, 1, 1], [], []>} : vector<32x32xf32>, vector<32x4xf32>, vector<32x4xf32> -> vector<32x4xf32>
    %101 = vector.extract_strided_slice %17 {offsets = [0, 20], sizes = [32, 4], strides = [1, 1]} : vector<32x32xf32> to vector<32x4xf32>
    %102 = vector.extract_strided_slice %18 {offsets = [0, 20], sizes = [32, 4], strides = [1, 1]} : vector<32x32xf32> to vector<32x4xf32>
    %103 = vector.extract_strided_slice %19 {offsets = [0, 20], sizes = [32, 4], strides = [1, 1]} : vector<32x32xf32> to vector<32x4xf32>
    %cst_34 = arith.constant dense<0.000000e+00> : vector<32x32xf32>
    %104 = tpu.matmul %101, %102, %cst_34 {dimension_numbers = #tpu.dot_dimension_numbers<[1], [1], [0], [0], [0, 0, 1, 0], [], []>} : vector<32x4xf32>, vector<32x4xf32>, vector<32x32xf32> -> vector<32x32xf32>
    %105 = arith.addf %104, %20 : vector<32x32xf32>
    %cst_35 = arith.constant dense<0xFF800000> : vector<32xf32>
    %106 = vector.multi_reduction <maximumf>, %105, %cst_35 [1] : vector<32x32xf32> to vector<32xf32>
    %107 = vector.shape_cast %106 : vector<32xf32> to vector<32x1xf32>
    %108 = vector.broadcast %107 : vector<32x1xf32> to vector<32x32xf32>
    %109 = arith.subf %105, %108 : vector<32x32xf32>
    %110 = math.exp %109 : vector<32x32xf32>
    %cst_36 = arith.constant dense<0.000000e+00> : vector<32xf32>
    %111 = vector.multi_reduction <add>, %110, %cst_36 [1] : vector<32x32xf32> to vector<32xf32>
    %112 = vector.shape_cast %111 : vector<32xf32> to vector<32x1xf32>
    %113 = tpu.reciprocal %112 {approx = true} : vector<32x1xf32> -> vector<32x1xf32>
    %114 = vector.broadcast %113 : vector<32x1xf32> to vector<32x32xf32>
    %115 = arith.mulf %110, %114 : vector<32x32xf32>
    %cst_37 = arith.constant dense<0.000000e+00> : vector<32x4xf32>
    %116 = tpu.matmul %115, %103, %cst_37 {dimension_numbers = #tpu.dot_dimension_numbers<[1], [0], [0], [1], [0, 0, 1, 1], [], []>} : vector<32x32xf32>, vector<32x4xf32>, vector<32x4xf32> -> vector<32x4xf32>
    %117 = vector.extract_strided_slice %17 {offsets = [0, 24], sizes = [32, 4], strides = [1, 1]} : vector<32x32xf32> to vector<32x4xf32>
    %118 = vector.extract_strided_slice %18 {offsets = [0, 24], sizes = [32, 4], strides = [1, 1]} : vector<32x32xf32> to vector<32x4xf32>
    %119 = vector.extract_strided_slice %19 {offsets = [0, 24], sizes = [32, 4], strides = [1, 1]} : vector<32x32xf32> to vector<32x4xf32>
    %cst_38 = arith.constant dense<0.000000e+00> : vector<32x32xf32>
    %120 = tpu.matmul %117, %118, %cst_38 {dimension_numbers = #tpu.dot_dimension_numbers<[1], [1], [0], [0], [0, 0, 1, 0], [], []>} : vector<32x4xf32>, vector<32x4xf32>, vector<32x32xf32> -> vector<32x32xf32>
    %121 = arith.addf %120, %20 : vector<32x32xf32>
    %cst_39 = arith.constant dense<0xFF800000> : vector<32xf32>
    %122 = vector.multi_reduction <maximumf>, %121, %cst_39 [1] : vector<32x32xf32> to vector<32xf32>
    %123 = vector.shape_cast %122 : vector<32xf32> to vector<32x1xf32>
    %124 = vector.broadcast %123 : vector<32x1xf32> to vector<32x32xf32>
    %125 = arith.subf %121, %124 : vector<32x32xf32>
    %126 = math.exp %125 : vector<32x32xf32>
    %cst_40 = arith.constant dense<0.000000e+00> : vector<32xf32>
    %127 = vector.multi_reduction <add>, %126, %cst_40 [1] : vector<32x32xf32> to vector<32xf32>
    %128 = vector.shape_cast %127 : vector<32xf32> to vector<32x1xf32>
    %129 = tpu.reciprocal %128 {approx = true} : vector<32x1xf32> -> vector<32x1xf32>
    %130 = vector.broadcast %129 : vector<32x1xf32> to vector<32x32xf32>
    %131 = arith.mulf %126, %130 : vector<32x32xf32>
    %cst_41 = arith.constant dense<0.000000e+00> : vector<32x4xf32>
    %132 = tpu.matmul %131, %119, %cst_41 {dimension_numbers = #tpu.dot_dimension_numbers<[1], [0], [0], [1], [0, 0, 1, 1], [], []>} : vector<32x32xf32>, vector<32x4xf32>, vector<32x4xf32> -> vector<32x4xf32>
    %133 = vector.extract_strided_slice %17 {offsets = [0, 28], sizes = [32, 4], strides = [1, 1]} : vector<32x32xf32> to vector<32x4xf32>
    %134 = vector.extract_strided_slice %18 {offsets = [0, 28], sizes = [32, 4], strides = [1, 1]} : vector<32x32xf32> to vector<32x4xf32>
    %135 = vector.extract_strided_slice %19 {offsets = [0, 28], sizes = [32, 4], strides = [1, 1]} : vector<32x32xf32> to vector<32x4xf32>
    %cst_42 = arith.constant dense<0.000000e+00> : vector<32x32xf32>
    %136 = tpu.matmul %133, %134, %cst_42 {dimension_numbers = #tpu.dot_dimension_numbers<[1], [1], [0], [0], [0, 0, 1, 0], [], []>} : vector<32x4xf32>, vector<32x4xf32>, vector<32x32xf32> -> vector<32x32xf32>
    %137 = arith.addf %136, %20 : vector<32x32xf32>
    %cst_43 = arith.constant dense<0xFF800000> : vector<32xf32>
    %138 = vector.multi_reduction <maximumf>, %137, %cst_43 [1] : vector<32x32xf32> to vector<32xf32>
    %139 = vector.shape_cast %138 : vector<32xf32> to vector<32x1xf32>
    %140 = vector.broadcast %139 : vector<32x1xf32> to vector<32x32xf32>
    %141 = arith.subf %137, %140 : vector<32x32xf32>
    %142 = math.exp %141 : vector<32x32xf32>
    %cst_44 = arith.constant dense<0.000000e+00> : vector<32xf32>
    %143 = vector.multi_reduction <add>, %142, %cst_44 [1] : vector<32x32xf32> to vector<32xf32>
    %144 = vector.shape_cast %143 : vector<32xf32> to vector<32x1xf32>
    %145 = tpu.reciprocal %144 {approx = true} : vector<32x1xf32> -> vector<32x1xf32>
    %146 = vector.broadcast %145 : vector<32x1xf32> to vector<32x32xf32>
    %147 = arith.mulf %142, %146 : vector<32x32xf32>
    %cst_45 = arith.constant dense<0.000000e+00> : vector<32x4xf32>
    %148 = tpu.matmul %147, %135, %cst_45 {dimension_numbers = #tpu.dot_dimension_numbers<[1], [0], [0], [1], [0, 0, 1, 1], [], []>} : vector<32x32xf32>, vector<32x4xf32>, vector<32x4xf32> -> vector<32x4xf32>
    %149 = tpu.concatenate %36, %52, %68, %84, %100, %116, %132, %148 in 1 : vector<32x4xf32>, vector<32x4xf32>, vector<32x4xf32>, vector<32x4xf32>, vector<32x4xf32>, vector<32x4xf32>, vector<32x4xf32>, vector<32x4xf32> -> vector<32x32xf32>
    %150 = arith.truncf %149 : vector<32x32xf32> to vector<32x32xbf16>
    %c0_46 = arith.constant 0 : index
    %c0_47 = arith.constant 0 : index
    %151 = vector.load %arg6[%c0_46, %c0_47] : memref<32x32xbf16, #tpu.memory_space<vmem>>, vector<32x32xbf16>
    %cst_48 = arith.constant dense<0.000000e+00> : vector<32x32xf32>
    %152 = tpu.matmul %150, %151, %cst_48 {dimension_numbers = #tpu.dot_dimension_numbers<[1], [0], [0], [1], [0, 0, 1, 1], [], []>} : vector<32x32xbf16>, vector<32x32xbf16>, vector<32x32xf32> -> vector<32x32xf32>
    %c0_49 = arith.constant 0 : index
    %c0_50 = arith.constant 0 : index
    %153 = vector.load %arg7[%c0_49, %c0_50] : memref<1x32xf32, #tpu.memory_space<vmem>>, vector<1x32xf32>
    %154 = vector.broadcast %153 : vector<1x32xf32> to vector<32x32xf32>
    %155 = arith.addf %152, %154 : vector<32x32xf32>
    %156 = arith.addf %8, %155 : vector<32x32xf32>
    %c0_51 = arith.constant 0 : index
    %c0_52 = arith.constant 0 : index
    %157 = vector.load %arg8[%c0_51, %c0_52] : memref<1x32xf32, #tpu.memory_space<vmem>>, vector<1x32xf32>
    %c0_53 = arith.constant 0 : index
    %c0_54 = arith.constant 0 : index
    %158 = vector.load %arg9[%c0_53, %c0_54] : memref<1x32xf32, #tpu.memory_space<vmem>>, vector<1x32xf32>
    %cst_55 = arith.constant dense<0.000000e+00> : vector<32xf32>
    %159 = vector.multi_reduction <add>, %156, %cst_55 [1] : vector<32x32xf32> to vector<32xf32>
    %160 = vector.shape_cast %159 : vector<32xf32> to vector<32x1xf32>
    %cst_56 = arith.constant 3.200000e+01 : f32
    %161 = vector.broadcast %cst_56 : f32 to vector<32x1xf32>
    %162 = arith.divf %160, %161 : vector<32x1xf32>
    %163 = vector.broadcast %162 : vector<32x1xf32> to vector<32x32xf32>
    %164 = arith.subf %156, %163 : vector<32x32xf32>
    %165 = arith.mulf %164, %164 : vector<32x32xf32>
    %cst_57 = arith.constant dense<0.000000e+00> : vector<32xf32>
    %166 = vector.multi_reduction <add>, %165, %cst_57 [1] : vector<32x32xf32> to vector<32xf32>
    %167 = vector.shape_cast %166 : vector<32xf32> to vector<32x1xf32>
    %cst_58 = arith.constant 3.200000e+01 : f32
    %168 = vector.broadcast %cst_58 : f32 to vector<32x1xf32>
    %169 = arith.divf %167, %168 : vector<32x1xf32>
    %170 = vector.broadcast %162 : vector<32x1xf32> to vector<32x32xf32>
    %171 = arith.subf %156, %170 : vector<32x32xf32>
    %cst_59 = arith.constant 9.99999974E-6 : f32
    %172 = vector.broadcast %cst_59 : f32 to vector<32x1xf32>
    %173 = arith.addf %169, %172 : vector<32x1xf32>
    %174 = math.rsqrt %173 : vector<32x1xf32>
    %175 = vector.broadcast %174 : vector<32x1xf32> to vector<32x32xf32>
    %176 = arith.mulf %171, %175 : vector<32x32xf32>
    %177 = vector.broadcast %157 : vector<1x32xf32> to vector<32x32xf32>
    %178 = arith.mulf %176, %177 : vector<32x32xf32>
    %179 = vector.broadcast %158 : vector<1x32xf32> to vector<32x32xf32>
    %180 = arith.addf %178, %179 : vector<32x32xf32>
    %181 = arith.truncf %180 : vector<32x32xf32> to vector<32x32xbf16>
    %c0_60 = arith.constant 0 : index
    %c0_61 = arith.constant 0 : index
    %182 = vector.load %arg10[%c0_60, %c0_61] : memref<32x128xbf16, #tpu.memory_space<vmem>>, vector<32x128xbf16>
    %cst_62 = arith.constant dense<0.000000e+00> : vector<32x128xf32>
    %183 = tpu.matmul %181, %182, %cst_62 {dimension_numbers = #tpu.dot_dimension_numbers<[1], [0], [0], [1], [0, 0, 1, 1], [], []>} : vector<32x32xbf16>, vector<32x128xbf16>, vector<32x128xf32> -> vector<32x128xf32>
    %c0_63 = arith.constant 0 : index
    %c0_64 = arith.constant 0 : index
    %184 = vector.load %arg11[%c0_63, %c0_64] : memref<1x128xf32, #tpu.memory_space<vmem>>, vector<1x128xf32>
    %185 = vector.broadcast %184 : vector<1x128xf32> to vector<32x128xf32>
    %186 = arith.addf %183, %185 : vector<32x128xf32>
    %cst_65 = arith.constant 0.000000e+00 : f32
    %187 = vector.broadcast %cst_65 : f32 to vector<32x128xf32>
    %188 = arith.maximumf %186, %187 : vector<32x128xf32>
    %189 = arith.truncf %188 : vector<32x128xf32> to vector<32x128xbf16>
    %c0_66 = arith.constant 0 : index
    %c0_67 = arith.constant 0 : index
    %190 = vector.load %arg12[%c0_66, %c0_67] : memref<128x32xbf16, #tpu.memory_space<vmem>>, vector<128x32xbf16>
    %cst_68 = arith.constant dense<0.000000e+00> : vector<32x32xf32>
    %191 = tpu.matmul %189, %190, %cst_68 {dimension_numbers = #tpu.dot_dimension_numbers<[1], [0], [0], [1], [0, 0, 1, 1], [], []>} : vector<32x128xbf16>, vector<128x32xbf16>, vector<32x32xf32> -> vector<32x32xf32>
    %c0_69 = arith.constant 0 : index
    %c0_70 = arith.constant 0 : index
    %192 = vector.load %arg13[%c0_69, %c0_70] : memref<1x32xf32, #tpu.memory_space<vmem>>, vector<1x32xf32>
    %193 = vector.broadcast %192 : vector<1x32xf32> to vector<32x32xf32>
    %194 = arith.addf %191, %193 : vector<32x32xf32>
    %195 = arith.addf %180, %194 : vector<32x32xf32>
    %c0_71 = arith.constant 0 : index
    %c0_72 = arith.constant 0 : index
    %196 = vector.load %arg14[%c0_71, %c0_72] : memref<1x32xf32, #tpu.memory_space<vmem>>, vector<1x32xf32>
    %c0_73 = arith.constant 0 : index
    %c0_74 = arith.constant 0 : index
    %197 = vector.load %arg15[%c0_73, %c0_74] : memref<1x32xf32, #tpu.memory_space<vmem>>, vector<1x32xf32>
    %cst_75 = arith.constant dense<0.000000e+00> : vector<32xf32>
    %198 = vector.multi_reduction <add>, %195, %cst_75 [1] : vector<32x32xf32> to vector<32xf32>
    %199 = vector.shape_cast %198 : vector<32xf32> to vector<32x1xf32>
    %cst_76 = arith.constant 3.200000e+01 : f32
    %200 = vector.broadcast %cst_76 : f32 to vector<32x1xf32>
    %201 = arith.divf %199, %200 : vector<32x1xf32>
    %202 = vector.broadcast %201 : vector<32x1xf32> to vector<32x32xf32>
    %203 = arith.subf %195, %202 : vector<32x32xf32>
    %204 = arith.mulf %203, %203 : vector<32x32xf32>
    %cst_77 = arith.constant dense<0.000000e+00> : vector<32xf32>
    %205 = vector.multi_reduction <add>, %204, %cst_77 [1] : vector<32x32xf32> to vector<32xf32>
    %206 = vector.shape_cast %205 : vector<32xf32> to vector<32x1xf32>
    %cst_78 = arith.constant 3.200000e+01 : f32
    %207 = vector.broadcast %cst_78 : f32 to vector<32x1xf32>
    %208 = arith.divf %206, %207 : vector<32x1xf32>
    %209 = vector.broadcast %201 : vector<32x1xf32> to vector<32x32xf32>
    %210 = arith.subf %195, %209 : vector<32x32xf32>
    %cst_79 = arith.constant 9.99999974E-6 : f32
    %211 = vector.broadcast %cst_79 : f32 to vector<32x1xf32>
    %212 = arith.addf %208, %211 : vector<32x1xf32>
    %213 = math.rsqrt %212 : vector<32x1xf32>
    %214 = vector.broadcast %213 : vector<32x1xf32> to vector<32x32xf32>
    %215 = arith.mulf %210, %214 : vector<32x32xf32>
    %216 = vector.broadcast %196 : vector<1x32xf32> to vector<32x32xf32>
    %217 = arith.mulf %215, %216 : vector<32x32xf32>
    %218 = vector.broadcast %197 : vector<1x32xf32> to vector<32x32xf32>
    %219 = arith.addf %217, %218 : vector<32x32xf32>
    %c0_80 = arith.constant 0 : index
    %c0_81 = arith.constant 0 : index
    %220 = vector.load %arg21[%c0_80, %c0_81] : memref<4x32xf32, #tpu.memory_space<vmem>>, vector<4x32xf32>
    %c0_82 = arith.constant 0 : index
    %c0_83 = arith.constant 0 : index
    %221 = vector.load %arg19[%c0_82, %c0_83] : memref<4x32xf32, #tpu.memory_space<vmem>>, vector<4x32xf32>
    %cst_84 = arith.constant dense<0.000000e+00> : vector<4x32xf32>
    %222 = tpu.matmul %221, %219, %cst_84 {dimension_numbers = #tpu.dot_dimension_numbers<[1], [0], [0], [1], [0, 0, 1, 1], [], []>} : vector<4x32xf32>, vector<32x32xf32>, vector<4x32xf32> -> vector<4x32xf32>
    %223 = arith.addf %220, %222 : vector<4x32xf32>
    %c0_85 = arith.constant 0 : index
    %c0_86 = arith.constant 0 : index
    %224 = vector.load %arg21[%c0_85, %c0_86] : memref<4x32xf32, #tpu.memory_space<vmem>>, vector<4x32xf32>
    tpu.vector_store %arg21[%c0_85, %c0_86], %223 {strides = array<i32>} : memref<4x32xf32, #tpu.memory_space<vmem>>, vector<4x32xf32>,
    %c0_i32_87 = arith.constant 0 : i32
    %225 = arith.cmpi eq, %arg0, %c0_i32_87 : i32
    %226 = arith.extui %225 : i1 to i32
    %c0_i32_88 = arith.constant 0 : i32
    %227 = arith.cmpi ne, %226, %c0_i32_88 : i32
    scf.if %227 {
      %c0_89 = arith.constant 0 : index
      %c0_90 = arith.constant 0 : index
      %228 = vector.load %arg21[%c0_89, %c0_90] : memref<4x32xf32, #tpu.memory_space<vmem>>, vector<4x32xf32>
      %229 = arith.truncf %228 : vector<4x32xf32> to vector<4x32xbf16>
      %c0_91 = arith.constant 0 : index
      %c0_92 = arith.constant 0 : index
      %230 = vector.load %arg16[%c0_91, %c0_92] : memref<32x5xbf16, #tpu.memory_space<vmem>>, vector<32x5xbf16>
      %cst_93 = arith.constant dense<0.000000e+00> : vector<4x5xf32>
      %231 = tpu.matmul %229, %230, %cst_93 {dimension_numbers = #tpu.dot_dimension_numbers<[1], [0], [0], [1], [0, 0, 1, 1], [], []>} : vector<4x32xbf16>, vector<32x5xbf16>, vector<4x5xf32> -> vector<4x5xf32>
      %c0_94 = arith.constant 0 : index
      %c0_95 = arith.constant 0 : index
      %232 = vector.load %arg17[%c0_94, %c0_95] : memref<1x5xf32, #tpu.memory_space<vmem>>, vector<1x5xf32>
      %233 = vector.broadcast %232 : vector<1x5xf32> to vector<4x5xf32>
      %234 = arith.addf %231, %233 : vector<4x5xf32>
      %c0_96 = arith.constant 0 : index
      %c0_97 = arith.constant 0 : index
      %235 = vector.load %arg20[%c0_96, %c0_97] : memref<4x5xf32, #tpu.memory_space<vmem>>, vector<4x5xf32>
      tpu.vector_store %arg20[%c0_96, %c0_97], %234 {strides = array<i32>} : memref<4x5xf32, #tpu.memory_space<vmem>>, vector<4x5xf32>,
    } else {
    }
    return
  }
  func.func @transform_0(%arg0: i32) -> (i32, i32) {
    %c0_i32 = arith.constant 0 : i32
    %c0_i32_0 = arith.constant 0 : i32
    return %arg0, %c0_i32 : i32, i32
  }
  func.func @transform_1(%arg0: i32) -> (i32, i32) {
    %c0_i32 = arith.constant 0 : i32
    %c0_i32_0 = arith.constant 0 : i32
    %c0_i32_1 = arith.constant 0 : i32
    return %c0_i32, %c0_i32_0 : i32, i32
  }
  func.func @transform_2(%arg0: i32) -> (i32, i32) {
    %c0_i32 = arith.constant 0 : i32
    %c0_i32_0 = arith.constant 0 : i32
    %c0_i32_1 = arith.constant 0 : i32
    return %c0_i32, %c0_i32_0 : i32, i32
  }
  func.func @transform_3(%arg0: i32) -> (i32, i32) {
    %c0_i32 = arith.constant 0 : i32
    %c0_i32_0 = arith.constant 0 : i32
    %c0_i32_1 = arith.constant 0 : i32
    return %c0_i32, %c0_i32_0 : i32, i32
  }
  func.func @transform_4(%arg0: i32) -> (i32, i32) {
    %c0_i32 = arith.constant 0 : i32
    %c0_i32_0 = arith.constant 0 : i32
    %c0_i32_1 = arith.constant 0 : i32
    return %c0_i32, %c0_i32_0 : i32, i32
  }
  func.func @transform_5(%arg0: i32) -> (i32, i32) {
    %c0_i32 = arith.constant 0 : i32
    %c0_i32_0 = arith.constant 0 : i32
    %c0_i32_1 = arith.constant 0 : i32
    return %c0_i32, %c0_i32_0 : i32, i32
  }
  func.func @transform_6(%arg0: i32) -> (i32, i32) {
    %c0_i32 = arith.constant 0 : i32
    %c0_i32_0 = arith.constant 0 : i32
    %c0_i32_1 = arith.constant 0 : i32
    return %c0_i32, %c0_i32_0 : i32, i32
  }
  func.func @transform_7(%arg0: i32) -> (i32, i32) {
    %c0_i32 = arith.constant 0 : i32
    %c0_i32_0 = arith.constant 0 : i32
    %c0_i32_1 = arith.constant 0 : i32
    return %c0_i32, %c0_i32_0 : i32, i32
  }
  func.func @transform_8(%arg0: i32) -> (i32, i32) {
    %c0_i32 = arith.constant 0 : i32
    %c0_i32_0 = arith.constant 0 : i32
    %c0_i32_1 = arith.constant 0 : i32
    return %c0_i32, %c0_i32_0 : i32, i32
  }
  func.func @transform_9(%arg0: i32) -> (i32, i32) {
    %c0_i32 = arith.constant 0 : i32
    %c0_i32_0 = arith.constant 0 : i32
    %c0_i32_1 = arith.constant 0 : i32
    return %c0_i32, %c0_i32_0 : i32, i32
  }
  func.func @transform_10(%arg0: i32) -> (i32, i32) {
    %c0_i32 = arith.constant 0 : i32
    %c0_i32_0 = arith.constant 0 : i32
    %c0_i32_1 = arith.constant 0 : i32
    return %c0_i32, %c0_i32_0 : i32, i32
  }
  func.func @transform_11(%arg0: i32) -> (i32, i32) {
    %c0_i32 = arith.constant 0 : i32
    %c0_i32_0 = arith.constant 0 : i32
    %c0_i32_1 = arith.constant 0 : i32
    return %c0_i32, %c0_i32_0 : i32, i32
  }
  func.func @transform_12(%arg0: i32) -> (i32, i32) {
    %c0_i32 = arith.constant 0 : i32
    %c0_i32_0 = arith.constant 0 : i32
    %c0_i32_1 = arith.constant 0 : i32
    return %c0_i32, %c0_i32_0 : i32, i32
  }
  func.func @transform_13(%arg0: i32) -> (i32, i32) {
    %c0_i32 = arith.constant 0 : i32
    %c0_i32_0 = arith.constant 0 : i32
    %c0_i32_1 = arith.constant 0 : i32
    return %c0_i32, %c0_i32_0 : i32, i32
  }
  func.func @transform_14(%arg0: i32) -> (i32, i32) {
    %c0_i32 = arith.constant 0 : i32
    %c0_i32_0 = arith.constant 0 : i32
    %c0_i32_1 = arith.constant 0 : i32
    return %c0_i32, %c0_i32_0 : i32, i32
  }
  func.func @transform_15(%arg0: i32) -> (i32, i32) {
    %c0_i32 = arith.constant 0 : i32
    %c0_i32_0 = arith.constant 0 : i32
    %c0_i32_1 = arith.constant 0 : i32
    return %c0_i32, %c0_i32_0 : i32, i32
  }
  func.func @transform_16(%arg0: i32) -> (i32, i32) {
    %c0_i32 = arith.constant 0 : i32
    %c0_i32_0 = arith.constant 0 : i32
    %c0_i32_1 = arith.constant 0 : i32
    return %c0_i32, %c0_i32_0 : i32, i32
  }
  func.func @transform_17(%arg0: i32) -> (i32, i32) {
    %c0_i32 = arith.constant 0 : i32
    %c0_i32_0 = arith.constant 0 : i32
    %c0_i32_1 = arith.constant 0 : i32
    return %c0_i32, %c0_i32_0 : i32, i32
  }
  func.func @transform_18(%arg0: i32) -> (i32, i32) {
    %c0_i32 = arith.constant 0 : i32
    %c0_i32_0 = arith.constant 0 : i32
    %c0_i32_1 = arith.constant 0 : i32
    return %c0_i32, %c0_i32_0 : i32, i32
  }
  func.func @transform_19(%arg0: i32) -> (i32, i32) {
    %c0_i32 = arith.constant 0 : i32
    %c0_i32_0 = arith.constant 0 : i32
    %c0_i32_1 = arith.constant 0 : i32
    return %c0_i32, %c0_i32_0 : i32, i32
  }
}

</mosaic_0001>

<bundles_post_ra>
// kernel: cnn_transformer_forward.1
= control target key start
LH: loop header
LB: loop body
LE: loop exit
PB: predicated region body
PF: predicated region fallthrough
CT: control target
= control target key end

     0   :  { %s5298_s0 = inlined_call_operand.vmem [shape: bf16[32,128], index: 0, kind: input, shape index: {}]   ;;  %s5299_s1 = inlined_call_operand.vmem [shape: bf16[128,32], index: 1, kind: input, shape index: {}]   ;;  %s5300_s2 = inlined_call_operand.vmem [shape: f32[1,32], index: 2, kind: input, shape index: {}]   ;;  %s5301_s3 = inlined_call_operand.vmem [shape: bf16[32,96], index: 3, kind: input, shape index: {}]   ;;  %s5302_s4 = inlined_call_operand.vmem [shape: f32[1,96], index: 4, kind: input, shape index: {}]   ;;  %s5303_s5 = inlined_call_operand.vmem [shape: bf16[32,32], index: 5, kind: input, shape index: {}]   ;;  %s5304_s6 = inlined_call_operand.vmem [shape: f32[1,32], index: 6, kind: input, shape index: {}]   ;;  %s5305_s7 = inlined_call_operand.vmem [shape: f32[1,32], index: 7, kind: input, shape index: {}]   ;;  %s5306_s8 = inlined_call_operand.vmem [shape: f32[1,32], index: 8, kind: input, shape index: {}]   ;;  %s5307_s9 = inlined_call_operand.vmem [shape: bf16[32,128], index: 9, kind: input, shape index: {}]   ;;  %s5308_s10 = inlined_call_operand.vmem [shape: f32[1,128], index: 10, kind: input, shape index: {}]   ;;  %s5309_s11 = inlined_call_operand.vmem [shape: bf16[128,32], index: 11, kind: input, shape index: {}]   ;;  %s5310_s12 = inlined_call_operand.vmem [shape: f32[1,32], index: 12, kind: input, shape index: {}]   ;;  %s5311_s13 = inlined_call_operand.vmem [shape: f32[1,32], index: 13, kind: input, shape index: {}]   ;;  %s5312_s14 = inlined_call_operand.vmem [shape: f32[1,32], index: 14, kind: input, shape index: {}]   ;;  %s5313_s15 = inlined_call_operand.vmem [shape: bf16[32,5], index: 15, kind: input, shape index: {}]   ;;  %s5314_s16 = inlined_call_operand.vmem [shape: f32[1,5], index: 16, kind: input, shape index: {}]   ;;  %s5315_s17 = inlined_call_operand.vmem [shape: f32[32,32], index: 17, kind: input, shape index: {}]   ;;  %s5316_s18 = inlined_call_operand.vmem [shape: f32[4,32], index: 18, kind: input, shape index: {}]   ;;  %s5317_s19 = inlined_call_operand.hbm [shape: f32[4,5], index: 19, kind: output, shape index: {}]  }
   0x1   :  { %5321 = sst [smem:[#allocation6_spill]] %s5298_s0 }
   0x2   :  { %5322 = sst [smem:[#allocation7_spill]] %s5299_s1 }
   0x3   :  { %5323 = sst [smem:[#allocation8_spill]] %s5300_s2 }
   0x4   :  { %5324 = sst [smem:[#allocation9_spill]] %s5301_s3 }
   0x5   :  { %s5325_s20 = sld [smem:[#allocation7_spill]]  ;;  %s5326_s26 = sld [smem:[#allocation6_spill]] }
   0xb   :  { %v4255_v0 = vld [vmem:[%s5325_s20] sm:$0xff]   ;;  %v4256_v1 = vld [vmem:[%s5325_s20 + $0x8] sm:$0xff]   ;;  %v4257_v2 = vld [vmem:[%s5325_s20 + $0x10] sm:$0xff]  }
   0xc   :  { %3518 = vmatprep.subr.bf16.mxu0 %v4255_v0  ;;  %v4258_v3 = vld [vmem:[%s5325_s20 + $0x18] sm:$0xff]   ;;  %v4263_v4 = vld [vmem:[%s5326_s26] sm:$0xff]   ;;  %v4260_v6 = vld [vmem:[%s5325_s20 + $0x28] sm:$0xff]  }
   0xd   :  { %3519 = vmatpush3.bf16.msra.mxu0 %v4255_v0  ;;  %v4259_v5 = vld [vmem:[%s5325_s20 + $0x20] sm:$0xff]   ;;  %3534 = vmatprep.mubr.bf16.mxu0 %v4263_v4  ;;  %v4261_v7 = vld [vmem:[%s5325_s20 + $0x30] sm:$0xff]  }
   0xe   :  { %3520 = vmatprep.subr.bf16.mxu0 %v4256_v1 }
  0x11   :  { %3521 = vmatpush3.bf16.msra.mxu0 %v4256_v1 }
  0x12   :  { %3522 = vmatprep.subr.bf16.mxu0 %v4257_v2 }
  0x15   :  { %3523 = vmatpush3.bf16.msra.mxu0 %v4257_v2 }
  0x16   :  { %3524 = vmatprep.subr.bf16.mxu0 %v4258_v3 }
  0x19   :  { %3525 = vmatpush3.bf16.msra.mxu0 %v4258_v3 }
  0x1a   :  { %3526 = vmatprep.subr.bf16.mxu0 %v4259_v5 }
  0x1d   :  { %3527 = vmatpush3.bf16.msra.mxu0 %v4259_v5 }
  0x1e   :  { %3528 = vmatprep.subr.bf16.mxu0 %v4260_v6 }
  0x1f   :  { %24 = vsyncpa [#allocation4], 0  ;;  %v4262_v8 = vld [vmem:[%s5325_s20 + $0x38] sm:$0xff]   ;;  %v4264_v9 = vld [vmem:[%s5326_s26 + $0x8] sm:$0xff]   ;;  %s5327_s3 = sld [smem:[#allocation9_spill]]  ;;  %s5328_s0 = sld [smem:[#allocation8_spill]] }
  0x20   :  { %vm231_vm0 = vcmask 261120   ;;  %v3221_v23 = vld [vmem:[%s5302_s4] ss:$0 sm:$0xff]  ;;  %vm307_vm1 = vcmask 31744   ;;  %s4453_s21 = smov 92   ;;  %s4454_s4 = smov 96  }
  0x21   :  { %3529 = vmatpush3.bf16.msra.mxu0 %v4260_v6  ;;  %s4455_s1 = smov 124   ;;  %s4456_s22 = smov 64   ;;  %vm4669_vm2 = vmpackc.low %vm307_vm1, %vm307_vm1  ;;  %v4702_v63 = vld [vmem:[%s5315_s17 + $0x8] sm:$0xff]  ;;  %v4707_v1 = vld [vmem:[%s5315_s17] sm:$0xff]  ;;  %vm2572_vm3 = vcmask 64512   ;;  %vm2577_vm4 = vcmask 97280  }
  0x22   :  { %3530 = vmatprep.subr.bf16.mxu0 %v4261_v7  ;;  %s4457_s29 = smov 60   ;;  %s4459_s26 = smov 120   ;;  %vm2582_vm5 = vcmask 130048   ;;  %vm2587_vm6 = vcmask 162816   ;;  %vm2592_vm7 = vcmask 195584   ;;  %vm2597_vm8 = vcmask 228352  }
  0x23   :  { %s4460_s30 = smov 56   ;;  %s4465_s2 = smov 112   ;;  %vm4484_vm9 = vmmov 0   ;;  %vm68_vm10 = vcmask 257024   ;;  %vm3194_vm11 = vcmask 35840  }
  0x24   :  { %s4466_s23 = smov 48   ;;  %s4467_s24 = smov 76  }
  0x25   :  { %3531 = vmatpush3.bf16.msra.mxu0 %v4261_v7  ;;  %v4265_v10 = vld [vmem:[%s5327_s3] sm:$0xff]   ;;  %v4266_v11 = vld [vmem:[%s5327_s3 + $0x8] sm:$0xff]   ;;  %s4468_s25 = smov 108   ;;  %s4478_s3 = smov 12  }
  0x26   :  { %3532 = vmatprep.subr.bf16.mxu0 %v4262_v8  ;;  %3538 = vmatprep.subr.bf16.mxu1 %v4265_v10  ;;  %v3210_v13 = vld [vmem:[%s5328_s0] ss:$0 sm:$0xff]  ;;  %s4458_s0 = smov 88   ;;  %s4479_s27 = smov 16  }
  0x27   :  { %3539 = vmatpush3.bf16.msra.mxu1 %v4265_v10  ;;  %s4480_s28 = smov 20   ;;  %s4481_s20 = smov 24  }
  0x28   :  { %3540 = vmatprep.subr.bf16.mxu1 %v4266_v11 }
  0x29   :  { %3533 = vmatpush3.bf16.msra.mxu0 %v4262_v8 }
  0x2b   :  { %3541 = vmatpush3.bf16.msra.mxu1 %v4266_v11 }
  0x2c   :  { %3535 = vmatmul.mubr.bf16.vlgmr.msra.gmra.mrb[0].mxu0 %v4264_v9 }
  0xff   :  { %v3536_v12 = vpop.f32.mrb[0].mxu0 }
 0x100   :  { %v191_v14 = vpop.f32.mrb[1].mxu0  ;;  %v4632_v20 = vadd.f32 %v3536_v12, %v3210_v13  ;;  %v4718_v12 = vld [vmem:[%s5315_s17 + $0x18] sm:$0xff] }
 0x101   :  { %v3537_v15 = vpop.f32.mrb[2].mxu0  ;;  %v4628_v18 = vadd.f32 %v3210_v13, %v191_v14 }
 0x102   :  { %v4626_v16 = vadd.f32 %v3537_v15, %v3210_v13  ;;  %v194_v17 = vpop.f32.mrb[3].mxu0 }
 0x103   :  { %v4630_v19 = vadd.f32 %v3210_v13, %v194_v17 }
 0x104   :  { %v207_v22 = vpack.c.bf16 %v4626_v16, %v4632_v20 }
 0x105   :  { %v206_v21 = vpack.c.bf16 %v4630_v19, %v4628_v18 }
 0x107   :  { %3542 = vmatprep.mubr.msk.bf16.mxu1 %vm231_vm0, %v206_v21 }
 0x108   :  { %3543 = vmatmul.mubr.msk.bf16.vlgmr.msra.gmra.mrb[0].mxu1 %vm231_vm0, %v207_v22 }
 0x1db   :  { %v3544_v24 = vpop.f32.mrb[0].mxu1 }
 0x1dc   :  { %v272_v25 = vpop.f32.mrb[1].mxu1  ;;  %v281_v28 = vadd.f32 %v3544_v24, %v3221_v23 }
 0x1dd   :  { %v273_v26 = vadd.f32 %v3221_v23, %v272_v25  ;;  %v3545_v27 = vpop.f32.mrb[2].mxu1  ;;  %v4730_v25 = vld [vmem:[%s5315_s17 + $0x10] sm:$0xff] }
 0x1de   :  { %v284_v29 = vadd.f32 %v3545_v27, %v3221_v23  ;;  %v275_v30 = vpop.f32.mrb[3].mxu1  ;;  %v4661_v37 = vmul.f32 0.5, %v281_v28 }
 0x1df   :  { %v276_v31 = vadd.f32 %v3221_v23, %v275_v30  ;;  %v4643_v32 = vmul.f32 0.5, %v273_v26 }
 0x1e0   :  { %v4645_v33 = vpack.i.bf16 %v284_v29, %v281_v28  ;;  %v4659_v36 = vmul.f32 0.5, %v284_v29 }
 0x1e1   :  { %3554 = vmatprep.mubr.msk.f32.mxu1 %vm307_vm1, %v4643_v32  ;;  %v4649_v34 = vpack.i.bf16 %v276_v31, %v273_v26  ;;  %v4655_v35 = vmul.f32 0.5, %v276_v31 }
 0x1e3   :  { %4036 = vrot.lane.b32.xlu1 %v4649_v34, %s4453_s21  ;;  %4026 = vrot.lane.b32.xlu0 %v4649_v34, %s4454_s4 }
 0x1e7   :  { %4041 = vrot.lane.b32.xlu1 %v4645_v33, %s4453_s21  ;;  %4031 = vrot.lane.b32.xlu0 %v4645_v33, %s4454_s4  ;;  %s4461_s21 = smov 84   ;;  %s4462_s4 = smov 116  }
 0x1eb   :  { %568 = vrot.lane.b32.xlu1 %v4655_v35, %s4455_s1  ;;  %566 = vrot.lane.b32.xlu0 %v4643_v32, %s4455_s1 }
 0x1ef   :  { %572 = vrot.lane.b32.xlu1 %v4659_v36, %s4455_s1  ;;  %570 = vrot.lane.b32.xlu0 %v4661_v37, %s4455_s1  ;;  %s4463_s1 = smov 52  }
 0x1f3   :  { %4046 = vrot.lane.b32.xlu1 %v4649_v34, %s4456_s22 }
 0x255   :  { %v4037_v38 = vpop.permute.xlu1 %4036  ;;  %v4027_v39 = vpop.permute.xlu0 %4026 }
 0x256   :  { %v4039_v40 = vunpack.i.h.bf16 %v4037_v38  ;;  %v4038_v41 = vunpack.i.l.bf16 %v4037_v38  ;;  %v4029_v42 = vunpack.i.h.bf16 %v4027_v39  ;;  %v4028_v43 = vunpack.i.l.bf16 %v4027_v39 }
 0x258   :  { %v3845_v45 = vpack.c.bf16 %v4039_v40, %v4038_v41  ;;  %v3825_v46 = vpack.c.bf16 %v4029_v42, %v4028_v43 }
 0x259   :  { %v4042_v47 = vpop.permute.xlu1 %4041  ;;  %v4032_v48 = vpop.permute.xlu0 %4031 }
 0x25a   :  { %v4044_v49 = vunpack.i.h.bf16 %v4042_v47  ;;  %v4043_v50 = vunpack.i.l.bf16 %v4042_v47  ;;  %v4034_v51 = vunpack.i.h.bf16 %v4032_v48  ;;  %v4033_v52 = vunpack.i.l.bf16 %v4032_v48  ;;  %3827 = vmatprep.subr.msk.bf16.mxu1 %vm4669_vm2, %v3825_v46  ;;  %3847 = vmatprep.subr.msk.bf16.mxu0 %vm4669_vm2, %v3845_v45 }
 0x25b   :  { %3830 = vmatpush3.bf16.xpose.msk.msra.mxu1 %vm4669_vm2, %v3825_v46  ;;  %3850 = vmatpush3.bf16.xpose.msk.msra.mxu0 %vm4669_vm2, %v3845_v45 }
 0x25c   :  { %v3851_v53 = vpack.c.bf16 %v4044_v49, %v4043_v50  ;;  %v3831_v54 = vpack.c.bf16 %v4034_v51, %v4033_v52 }
 0x25d   :  { %v569_v55 = vpop.permute.xlu1 %568  ;;  %v567_v56 = vpop.permute.xlu0 %566 }
 0x25e   :  { %3833 = vmatprep.subr.msk.bf16.mxu1 %vm4669_vm2, %v3831_v54  ;;  %3853 = vmatprep.subr.msk.bf16.mxu0 %vm4669_vm2, %v3851_v53 }
 0x25f   :  { %3582 = vmatprep.mubr.msk.f32.mxu0 %vm307_vm1, %v567_v56 }
 0x261   :  { %v573_v57 = vpop.permute.xlu1 %572  ;;  %v571_v62 = vpop.permute.xlu0 %570 }
 0x263   :  { %3836 = vmatpush3.bf16.xpose.msk.msra.mxu1 %vm4669_vm2, %v3831_v54  ;;  %3856 = vmatpush3.bf16.xpose.msk.msra.mxu0 %vm4669_vm2, %v3851_v53 }
 0x265   :  { %v4047_v58 = vpop.permute.xlu1 %4046 }
 0x266   :  { %v4049_v59 = vunpack.i.h.bf16 %v4047_v58  ;;  %v4048_v60 = vunpack.i.l.bf16 %v4047_v58 }
 0x268   :  { %v3837_v61 = vpack.c.bf16 %v4049_v59, %v4048_v60 }
 0x26a   :  { %3555 = vmatmul.mubr.msk.f32.vlgmr.msra.gmra.mrb[4].mxu1 %vm307_vm1, %v4655_v35  ;;  %3838 = vmatprep.subr.bf16.mxu1 %v3837_v61 }
 0x26b   :  { %3583 = vmatmul.mubr.msk.f32.vlgmr.msra.gmra.mrb[4].mxu0 %vm307_vm1, %v569_v55  ;;  %3557 = vmatprep.mubr.msk.f32.mxu1 %vm307_vm1, %v4661_v37 }
 0x26c   :  { %3840 = vmatpush3.bf16.msra.mxu1 %v3837_v61  ;;  %3585 = vmatprep.mubr.msk.f32.mxu0 %vm307_vm1, %v571_v62 }
 0x26e   :  { %3558 = vmatmul.mubr.msk.f32.gmra.mrb[6].mxu1 %vm307_vm1, %v4659_v36 }
 0x26f   :  { %3586 = vmatmul.mubr.msk.f32.gmra.mrb[6].mxu0 %vm307_vm1, %v573_v57 }
 0x33d   :  { %v3556_v0 = vpop.f32.mrb[4].mxu1 }
 0x33e   :  { %v400_v2 = vadd.f32 %v3556_v0, %v4702_v63  ;;  %v3584_v3 = vpop.f32.mrb[4].mxu0  ;;  %v394_v4 = vpop.f32.mrb[5].mxu1 }
 0x33f   :  { %v670_v5 = vadd.f32 %v3584_v3, %v4702_v63  ;;  %v664_v6 = vpop.f32.mrb[5].mxu0  ;;  %v395_v9 = vadd.f32 %v394_v4, %v4707_v1 }
 0x340   :  { %v665_v7 = vadd.f32 %v664_v6, %v4707_v1  ;;  %v416_v8 = vsel %vm231_vm0, %v400_v2, -inf }
 0x341   :  { %v686_v10 = vsel %vm231_vm0, %v670_v5, -inf  ;;  %417 = vmax.xlane.f32.xlu1 %v416_v8  ;;  %v3559_v11 = vpop.f32.mrb[6].mxu1  ;;  %v413_v22 = vsel %vm231_vm0, %v395_v9, -inf }
 0x342   :  { %687 = vmax.xlane.f32.xlu0 %v686_v10  ;;  %v3587_v13 = vpop.f32.mrb[6].mxu0  ;;  %v404_v14 = vpop.f32.mrb[7].mxu1  ;;  %v683_v17 = vsel %vm231_vm0, %v665_v7, -inf  ;;  %v410_v21 = vadd.f32 %v3559_v11, %v4718_v12 }
 0x343   :  { %v674_v15 = vpop.f32.mrb[7].mxu0  ;;  %v4724_v23 = vadd.f32 %v3587_v13, %v4718_v12  ;;  %v4733_v26 = vadd.f32 %v404_v14, %v4730_v25 }
 0x344   :  { %v422_v24 = vsel %vm231_vm0, %v410_v21, -inf  ;;  %v4744_v29 = vadd.f32 %v674_v15, %v4730_v25 }
 0x345   :  { %684 = vmax.xlane.f32.xlu1 %v683_v17  ;;  %v692_v27 = vsel %vm231_vm0, %v4724_v23, -inf  ;;  %v419_v28 = vsel %vm231_vm0, %v4733_v26, -inf }
 0x346   :  { %414 = vmax.xlane.f32.xlu0 %v413_v22  ;;  %v689_v30 = vsel %vm231_vm0, %v4744_v29, -inf }
 0x34a   :  { %423 = vmax.xlane.f32.xlu0 %v422_v24 }
 0x34e   :  { %693 = vmax.xlane.f32.xlu0 %v692_v27 }
 0x352   :  { %420 = vmax.xlane.f32.xlu0 %v419_v28 }
 0x356   :  { %4056 = vrot.lane.b32.xlu1 %v4649_v34, %s4457_s29 }
 0x368   :  { %4051 = vrot.lane.b32.xlu0 %v4645_v33, %s4456_s22  ;;  %s4464_s22 = smov 80  }
 0x37a   :  { %690 = vmax.xlane.f32.xlu1 %v689_v30 }
 0x3ce   :  { %v418_v31 = vpop.xlane.xlu1 %417 }
 0x3cf   :  { %v688_v38 = vpop.xlane.xlu0 %687  ;;  %v426_v39 = vsub.f32 %v400_v2, %v418_v31 }
 0x3d0   :  { %v696_v40 = vsub.f32 %v670_v5, %v688_v38 }
 0x3d1   :  { %v431_v41 = vmul.f32 1.442695, %v426_v39 }
 0x3d2   :  { %v701_v42 = vmul.f32 1.442695, %v696_v40  ;;  %v685_v43 = vpop.xlane.xlu1 %684 }
 0x3d3   :  { %4281 = vpow2.f32 %v431_v41  ;;  %v695_v45 = vsub.f32 %v665_v7, %v685_v43  ;;  %v415_v46 = vpop.xlane.xlu0 %414 }
 0x3d4   :  { %v425_v47 = vsub.f32 %v395_v9, %v415_v46  ;;  %4283 = vpow2.f32 %v701_v42 }
 0x3d5   :  { %v699_v48 = vmul.f32 1.442695, %v695_v45 }
 0x3d6   :  { %v429_v49 = vmul.f32 1.442695, %v425_v47  ;;  %v4057_v59 = vpop.permute.xlu1 %4056 }
 0x3d7   :  { %v424_v50 = vpop.xlane.xlu0 %423  ;;  %v4059_v4 = vunpack.i.h.bf16 %v4057_v59  ;;  %v4058_v5 = vunpack.i.l.bf16 %v4057_v59 }
 0x3d8   :  { %4285 = vpow2.f32 %v429_v49  ;;  %v428_v51 = vsub.f32 %v410_v21, %v424_v50 }
 0x3d9   :  { %4287 = vpow2.f32 %v699_v48  ;;  %v3857_v10 = vpack.c.bf16 %v4059_v4, %v4058_v5 }
 0x3da   :  { %v435_v52 = vmul.f32 1.442695, %v428_v51 }
 0x3db   :  { %v694_v53 = vpop.xlane.xlu0 %693 }
 0x3dc   :  { %4289 = vpow2.f32 %v435_v52  ;;  %v698_v11 = vsub.f32 %v4724_v23, %v694_v53 }
 0x3dd   :  { %v4748_v54 = vpop.eup %4281 }
 0x3de   :  { %v440_v55 = vsel %vm231_vm0, %v4748_v54, 0.0  ;;  %v4752_v56 = vpop.eup %4283  ;;  %v705_v14 = vmul.f32 1.442695, %v698_v11 }
 0x3df   :  { %v421_v57 = vpop.xlane.xlu0 %420  ;;  %441 = vadd.xlane.f32.xlu0 %v440_v55  ;;  %v710_v60 = vsel %vm231_vm0, %v4752_v56, 0.0 }
 0x3e0   :  { %v427_v13 = vsub.f32 %v4733_v26, %v421_v57  ;;  %4291 = vpow2.f32 %v705_v14 }
 0x3e2   :  { %v4754_v58 = vpop.eup %4285  ;;  %v433_v15 = vmul.f32 1.442695, %v427_v13 }
 0x3e3   :  { %v4052_v61 = vpop.permute.xlu0 %4051  ;;  %711 = vadd.xlane.f32.xlu0 %v710_v60  ;;  %v437_v62 = vsel %vm231_vm0, %v4754_v58, 0.0  ;;  %v4760_v0 = vpop.eup %4287 }
 0x3e4   :  { %v4054_v2 = vunpack.i.h.bf16 %v4052_v61  ;;  %v4053_v3 = vunpack.i.l.bf16 %v4052_v61  ;;  %438 = vadd.xlane.f32.xlu1 %v437_v62  ;;  %v707_v8 = vsel %vm231_vm0, %v4760_v0, 0.0  ;;  %4293 = vpow2.f32 %v433_v15 }
 0x3e6   :  { %v4762_v6 = vpop.eup %4289  ;;  %v3841_v7 = vpack.c.bf16 %v4054_v2, %v4053_v3 }
 0x3e7   :  { %v446_v9 = vsel %vm231_vm0, %v4762_v6, 0.0 }
 0x3e8   :  { %708 = vadd.xlane.f32.xlu1 %v707_v8  ;;  %447 = vadd.xlane.f32.xlu0 %v446_v9 }
 0x3e9   :  { %3842 = vmatprep.subr.bf16.mxu1 %v3841_v7 }
 0x3ea   :  { %3844 = vmatpush3.bf16.msra.mxu1 %v3841_v7  ;;  %v4773_v17 = vpop.eup %4291 }
 0x3eb   :  { %3858 = vmatprep.subr.bf16.mxu1 %v3857_v10  ;;  %v716_v22 = vsel %vm231_vm0, %v4773_v17, 0.0 }
 0x3ee   :  { %v4294_v21 = vpop.eup %4293 }
 0x3ef   :  { %v443_v24 = vsel %vm231_vm0, %v4294_v21, 0.0 }
 0x3f9   :  { %4066 = vrot.lane.b32.xlu1 %v4649_v34, %s4458_s0 }
 0x3fe   :  { %4061 = vrot.lane.b32.xlu0 %v4645_v33, %s4457_s29 }
 0x407   :  { %v691_v23 = vpop.xlane.xlu1 %690 }
 0x408   :  { %v697_v26 = vsub.f32 %v4744_v29, %v691_v23 }
 0x40a   :  { %v703_v27 = vmul.f32 1.442695, %v697_v26 }
 0x40c   :  { %4295 = vpow2.f32 %v703_v27 }
 0x416   :  { %v4296_v28 = vpop.eup %4295 }
 0x417   :  { %v713_v30 = vsel %vm231_vm0, %v4296_v28, 0.0 }
 0x41d   :  { %717 = vadd.xlane.f32.xlu0 %v716_v22  ;;  %444 = vadd.xlane.f32.xlu1 %v443_v24 }
 0x42e   :  { %4071 = vrot.lane.b32.xlu1 %v4645_v33, %s4458_s0 }
 0x433   :  { %836 = vrot.lane.b32.xlu0 %v4643_v32, %s4459_s26 }
 0x437   :  { %840 = vrot.lane.b32.xlu0 %v4661_v37, %s4459_s26 }
 0x452   :  { %714 = vadd.xlane.f32.xlu1 %v713_v30 }
 0x463   :  { %838 = vrot.lane.b32.xlu1 %v4655_v35, %s4459_s26 }
 0x467   :  { %842 = vrot.lane.b32.xlu1 %v4659_v36, %s4459_s26 }
 0x46c   :  { %v442_v31 = vpop.xlane.xlu0 %441 }
 0x46d   :  { %4297 = vrcp.f32 %v442_v31 }
 0x470   :  { %v712_v38 = vpop.xlane.xlu0 %711 }
 0x471   :  { %v439_v39 = vpop.xlane.xlu1 %438 }
 0x472   :  { %4299 = vrcp.f32 %v439_v39 }
 0x475   :  { %v448_v40 = vpop.xlane.xlu0 %447  ;;  %v709_v41 = vpop.xlane.xlu1 %708 }
 0x476   :  { %4301 = vrcp.f32 %v709_v41 }
 0x477   :  { %v4298_v43 = vpop.eup %4297  ;;  %4303 = vrcp.f32 %v448_v40 }
 0x478   :  { %v454_v49 = vmul.f32 %v4298_v43, %v4748_v54 }
 0x479   :  { %v4062_v42 = vpop.permute.xlu0 %4061  ;;  %v4067_v47 = vpop.permute.xlu1 %4066 }
 0x47a   :  { %v4064_v45 = vunpack.i.h.bf16 %v4062_v42  ;;  %v4063_v46 = vunpack.i.l.bf16 %v4062_v42  ;;  %v4069_v50 = vunpack.i.h.bf16 %v4067_v47  ;;  %v4068_v51 = vunpack.i.l.bf16 %v4067_v47 }
 0x47c   :  { %v4300_v29 = vpop.eup %4299  ;;  %v3861_v52 = vpack.c.bf16 %v4064_v45, %v4063_v46  ;;  %v3865_v53 = vpack.c.bf16 %v4069_v50, %v4068_v51 }
 0x47d   :  { %v453_v48 = vmul.f32 %v4300_v29, %v4754_v58 }
 0x47f   :  { %3568 = vmatprep.mubr.msk.f32.mxu1 %vm231_vm0, %v453_v48 }
 0x480   :  { %3569 = vmatmul.mubr.msk.f32.vlgmr.msra.gmra.mrb[8].mxu1 %vm231_vm0, %v454_v49  ;;  %v4302_v54 = vpop.eup %4301 }
 0x481   :  { %3860 = vmatpush3.bf16.msra.mxu1 %v3857_v10  ;;  %v4304_v57 = vpop.eup %4303  ;;  %v723_v2 = vmul.f32 %v4302_v54, %v4760_v0 }
 0x482   :  { %3862 = vmatprep.subr.bf16.mxu1 %v3861_v52  ;;  %v456_v61 = vmul.f32 %v4304_v57, %v4762_v6 }
 0x485   :  { %3864 = vmatpush3.bf16.msra.mxu1 %v3861_v52 }
 0x486   :  { %3867 = vmatprep.subr.msk.bf16.mxu1 %vm4669_vm2, %v3865_v53 }
 0x4aa   :  { %v445_v55 = vpop.xlane.xlu1 %444  ;;  %v718_v0 = vpop.xlane.xlu0 %717 }
 0x4ab   :  { %4305 = vrcp.f32 %v445_v55 }
 0x4ac   :  { %4307 = vrcp.f32 %v712_v38 }
 0x4ad   :  { %4309 = vrcp.f32 %v718_v0 }
 0x4ae   :  { %v4072_v59 = vpop.permute.xlu1 %4071 }
 0x4af   :  { %v4074_v3 = vunpack.i.h.bf16 %v4072_v59  ;;  %v4073_v4 = vunpack.i.l.bf16 %v4072_v59 }
 0x4b1   :  { %v3871_v7 = vpack.c.bf16 %v4074_v3, %v4073_v4 }
 0x4b5   :  { %v4306_v58 = vpop.eup %4305 }
 0x4b6   :  { %v455_v60 = vmul.f32 %v4306_v58, %v4294_v21  ;;  %v4308_v62 = vpop.eup %4307 }
 0x4b7   :  { %v724_v5 = vmul.f32 %v4308_v62, %v4752_v56  ;;  %v4310_v8 = vpop.eup %4309  ;;  %v837_v56 = vpop.permute.xlu0 %836 }
 0x4b8   :  { %3571 = vmatprep.mubr.msk.f32.mxu1 %vm231_vm0, %v455_v60  ;;  %v726_v11 = vmul.f32 %v4310_v8, %v4773_v17 }
 0x4b9   :  { %3572 = vmatmul.mubr.msk.f32.gmra.mrb[10].mxu1 %vm231_vm0, %v456_v61 }
 0x4ba   :  { %3596 = vmatprep.mubr.msk.f32.mxu1 %vm231_vm0, %v723_v2 }
 0x4bb   :  { %v841_v14 = vpop.permute.xlu0 %840 }
 0x4bd   :  { %3597 = vmatmul.mubr.msk.f32.vlgmr.msra.gmra.mrb[12].mxu1 %vm231_vm0, %v724_v5 }
 0x4be   :  { %3870 = vmatpush3.bf16.xpose.msk.msra.mxu1 %vm4669_vm2, %v3865_v53 }
 0x4bf   :  { %3873 = vmatprep.subr.msk.bf16.mxu1 %vm4669_vm2, %v3871_v7 }
 0x4c6   :  { %3876 = vmatpush3.bf16.xpose.msk.msra.mxu1 %vm4669_vm2, %v3871_v7 }
 0x4df   :  { %v715_v6 = vpop.xlane.xlu1 %714 }
 0x4e0   :  { %4311 = vrcp.f32 %v715_v6 }
 0x4e3   :  { %v839_v13 = vpop.permute.xlu1 %838 }
 0x4e7   :  { %v843_v15 = vpop.permute.xlu1 %842 }
 0x4ea   :  { %v4312_v9 = vpop.eup %4311 }
 0x4eb   :  { %v725_v10 = vmul.f32 %v4312_v9, %v4296_v28 }
 0x4ed   :  { %3599 = vmatprep.mubr.msk.f32.mxu1 %vm231_vm0, %v725_v10 }
 0x4ee   :  { %3600 = vmatmul.mubr.msk.f32.gmra.mrb[14].mxu1 %vm231_vm0, %v726_v11 }
 0x4ef   :  { %3610 = vmatprep.mubr.msk.f32.mxu1 %vm307_vm1, %v837_v56 }
 0x4f2   :  { %3611 = vmatmul.mubr.msk.f32.vlgmr.msra.gmra.mrb[16].mxu1 %vm307_vm1, %v839_v13 }
 0x4f3   :  { %3613 = vmatprep.mubr.msk.f32.mxu1 %vm307_vm1, %v841_v14 }
 0x4f6   :  { %3614 = vmatmul.mubr.msk.f32.gmra.mrb[18].mxu1 %vm307_vm1, %v843_v15 }
 0x553   :  { %v4811_v21 = vpop.f32.mrb[8].mxu1 }
 0x554   :  { %v4813_v22 = vpop.f32.mrb[9].mxu1 }
 0x58c   :  { %v4815_v17 = vpop.f32.mrb[10].mxu1 }
 0x58d   :  { %v4817_v24 = vpop.f32.mrb[11].mxu1 }
 0x590   :  { %v4819_v23 = vpop.f32.mrb[12].mxu1 }
 0x591   :  { %v4821_v26 = vpop.f32.mrb[13].mxu1 }
 0x592   :  { %v4185_v27 = vpack.i.bf16 %v4819_v23, %v4821_v26 }
 0x5c1   :  { %v4825_v28 = vpop.f32.mrb[14].mxu1 }
 0x5c2   :  { %v4827_v30 = vpop.f32.mrb[15].mxu1 }
 0x5c3   :  { %v4190_v31 = vpack.i.bf16 %v4825_v28, %v4827_v30 }
 0x5c5   :  { %v3612_v38 = vpop.f32.mrb[16].mxu1 }
 0x5c6   :  { %v940_v39 = vadd.f32 %v3612_v38, %v4702_v63  ;;  %v934_v40 = vpop.f32.mrb[17].mxu1 }
 0x5c7   :  { %v935_v41 = vadd.f32 %v934_v40, %v4707_v1 }
 0x5c8   :  { %v956_v42 = vsel %vm231_vm0, %v940_v39, -inf }
 0x5c9   :  { %957 = vmax.xlane.f32.xlu1 %v956_v42  ;;  %v3615_v43 = vpop.f32.mrb[18].mxu1  ;;  %v953_v29 = vsel %vm231_vm0, %v935_v41, -inf }
 0x5ca   :  { %v944_v45 = vpop.f32.mrb[19].mxu1  ;;  %954 = vmax.xlane.f32.xlu0 %v953_v29  ;;  %v950_v47 = vadd.f32 %v3615_v43, %v4718_v12 }
 0x5cb   :  { %v945_v46 = vadd.f32 %v944_v45, %v4730_v25 }
 0x5cc   :  { %v962_v49 = vsel %vm231_vm0, %v950_v47, -inf }
 0x5cd   :  { %v959_v48 = vsel %vm231_vm0, %v945_v46, -inf }
 0x5ce   :  { %960 = vmax.xlane.f32.xlu0 %v959_v48 }
 0x5d2   :  { %963 = vmax.xlane.f32.xlu0 %v962_v49 }
 0x5da   :  { %4076 = vrot.lane.b32.xlu1 %v4649_v34, %s4460_s30 }
 0x5de   :  { %4086 = vrot.lane.b32.xlu1 %v4649_v34, %s4461_s21 }
 0x656   :  { %v958_v50 = vpop.xlane.xlu1 %957 }
 0x657   :  { %v966_v51 = vsub.f32 %v940_v39, %v958_v50  ;;  %v955_v52 = vpop.xlane.xlu0 %954 }
 0x658   :  { %v965_v53 = vsub.f32 %v935_v41, %v955_v52 }
 0x659   :  { %v971_v55 = vmul.f32 1.442695, %v966_v51 }
 0x65a   :  { %v969_v54 = vmul.f32 1.442695, %v965_v53  ;;  %v4077_v57 = vpop.permute.xlu1 %4076 }
 0x65b   :  { %4313 = vpow2.f32 %v971_v55  ;;  %v4079_v58 = vunpack.i.h.bf16 %v4077_v57  ;;  %v4078_v59 = vunpack.i.l.bf16 %v4077_v57  ;;  %v961_v4 = vpop.xlane.xlu0 %960 }
 0x65c   :  { %4315 = vpow2.f32 %v969_v54  ;;  %v967_v0 = vsub.f32 %v945_v46, %v961_v4 }
 0x65d   :  { %v3877_v60 = vpack.c.bf16 %v4079_v58, %v4078_v59 }
 0x65e   :  { %v973_v8 = vmul.f32 1.442695, %v967_v0  ;;  %v4087_v13 = vpop.permute.xlu1 %4086 }
 0x65f   :  { %3878 = vmatprep.subr.bf16.mxu0 %v3877_v60  ;;  %v964_v5 = vpop.xlane.xlu0 %963  ;;  %v4089_v39 = vunpack.i.h.bf16 %v4087_v13  ;;  %v4088_v40 = vunpack.i.l.bf16 %v4087_v13 }
 0x660   :  { %3880 = vmatpush3.bf16.msra.mxu0 %v3877_v60  ;;  %v968_v7 = vsub.f32 %v950_v47, %v964_v5 }
 0x661   :  { %v3885_v29 = vpack.c.bf16 %v4089_v39, %v4088_v40 }
 0x662   :  { %v975_v6 = vmul.f32 1.442695, %v968_v7 }
 0x664   :  { %4317 = vpow2.f32 %v975_v6 }
 0x665   :  { %v4314_v61 = vpop.eup %4313  ;;  %4319 = vpow2.f32 %v973_v8 }
 0x666   :  { %v4316_v62 = vpop.eup %4315  ;;  %v980_v2 = vsel %vm231_vm0, %v4314_v61, 0.0 }
 0x667   :  { %981 = vadd.xlane.f32.xlu0 %v980_v2  ;;  %v977_v3 = vsel %vm231_vm0, %v4316_v62, 0.0 }
 0x668   :  { %978 = vadd.xlane.f32.xlu1 %v977_v3 }
 0x66e   :  { %v4318_v9 = vpop.eup %4317 }
 0x66f   :  { %v4320_v10 = vpop.eup %4319  ;;  %v986_v56 = vsel %vm231_vm0, %v4318_v9, 0.0 }
 0x670   :  { %v983_v11 = vsel %vm231_vm0, %v4320_v10, 0.0 }
 0x679   :  { %4091 = vrot.lane.b32.xlu1 %v4645_v33, %s4461_s21  ;;  %s4469_s21 = smov 44  }
 0x67d   :  { %4081 = vrot.lane.b32.xlu0 %v4645_v33, %s4460_s30 }
 0x69c   :  { %987 = vadd.xlane.f32.xlu0 %v986_v56 }
 0x69d   :  { %984 = vadd.xlane.f32.xlu1 %v983_v11 }
 0x6ae   :  { %1108 = vrot.lane.b32.xlu1 %v4655_v35, %s4462_s4 }
 0x6b2   :  { %1112 = vrot.lane.b32.xlu1 %v4659_v36, %s4462_s4  ;;  %1106 = vrot.lane.b32.xlu0 %v4643_v32, %s4462_s4 }
 0x6b6   :  { %1110 = vrot.lane.b32.xlu0 %v4661_v37, %s4462_s4  ;;  %s4470_s4 = smov 72  }
 0x6f4   :  { %v982_v14 = vpop.xlane.xlu0 %981 }
 0x6f5   :  { %4321 = vrcp.f32 %v982_v14  ;;  %v979_v15 = vpop.xlane.xlu1 %978 }
 0x6f6   :  { %4323 = vrcp.f32 %v979_v15 }
 0x6f8   :  { %v4082_v38 = vpop.permute.xlu0 %4081 }
 0x6f9   :  { %v4084_v41 = vunpack.i.h.bf16 %v4082_v38  ;;  %v4083_v42 = vunpack.i.l.bf16 %v4082_v38  ;;  %v4092_v46 = vpop.permute.xlu1 %4091 }
 0x6fa   :  { %v4094_v50 = vunpack.i.h.bf16 %v4092_v46  ;;  %v4093_v51 = vunpack.i.l.bf16 %v4092_v46 }
 0x6fb   :  { %v3881_v43 = vpack.c.bf16 %v4084_v41, %v4083_v42 }
 0x6fc   :  { %v3891_v52 = vpack.c.bf16 %v4094_v50, %v4093_v51 }
 0x6fd   :  { %3882 = vmatprep.subr.bf16.mxu0 %v3881_v43 }
 0x6fe   :  { %3884 = vmatpush3.bf16.msra.mxu0 %v3881_v43 }
 0x6ff   :  { %v4322_v45 = vpop.eup %4321  ;;  %3887 = vmatprep.subr.msk.bf16.mxu0 %vm4669_vm2, %v3885_v29 }
 0x700   :  { %v4324_v47 = vpop.eup %4323  ;;  %v994_v49 = vmul.f32 %v4322_v45, %v4314_v61 }
 0x701   :  { %v993_v48 = vmul.f32 %v4324_v47, %v4316_v62 }
 0x703   :  { %3624 = vmatprep.mubr.msk.f32.mxu0 %vm231_vm0, %v993_v48 }
 0x704   :  { %3625 = vmatmul.mubr.msk.f32.vlgmr.msra.gmra.mrb[8].mxu0 %vm231_vm0, %v994_v49 }
 0x707   :  { %3890 = vmatpush3.bf16.xpose.msk.msra.mxu0 %vm4669_vm2, %v3885_v29 }
 0x708   :  { %3893 = vmatprep.subr.msk.bf16.mxu0 %vm4669_vm2, %v3891_v52 }
 0x70f   :  { %3896 = vmatpush3.bf16.xpose.msk.msra.mxu0 %vm4669_vm2, %v3891_v52 }
 0x729   :  { %v988_v53 = vpop.xlane.xlu0 %987 }
 0x72a   :  { %4325 = vrcp.f32 %v988_v53  ;;  %v985_v55 = vpop.xlane.xlu1 %984 }
 0x72b   :  { %4327 = vrcp.f32 %v985_v55 }
 0x72d   :  { %v1107_v59 = vpop.permute.xlu0 %1106 }
 0x72e   :  { %v1109_v61 = vpop.permute.xlu1 %1108 }
 0x731   :  { %v1111_v62 = vpop.permute.xlu0 %1110 }
 0x732   :  { %v1113_v2 = vpop.permute.xlu1 %1112 }
 0x734   :  { %v4326_v54 = vpop.eup %4325 }
 0x735   :  { %v4328_v57 = vpop.eup %4327  ;;  %v996_v60 = vmul.f32 %v4326_v54, %v4318_v9 }
 0x736   :  { %v995_v58 = vmul.f32 %v4328_v57, %v4320_v10 }
 0x738   :  { %3627 = vmatprep.mubr.msk.f32.mxu0 %vm231_vm0, %v995_v58 }
 0x739   :  { %3628 = vmatmul.mubr.msk.f32.gmra.mrb[10].mxu0 %vm231_vm0, %v996_v60 }
 0x73a   :  { %3638 = vmatprep.mubr.msk.f32.mxu0 %vm307_vm1, %v1107_v59 }
 0x73d   :  { %3639 = vmatmul.mubr.msk.f32.vlgmr.msra.gmra.mrb[12].mxu0 %vm307_vm1, %v1109_v61 }
 0x73e   :  { %3641 = vmatprep.mubr.msk.f32.mxu0 %vm307_vm1, %v1111_v62 }
 0x741   :  { %3642 = vmatmul.mubr.msk.f32.gmra.mrb[14].mxu0 %vm307_vm1, %v1113_v2 }
 0x7d7   :  { %v4867_v3 = vpop.f32.mrb[8].mxu0 }
 0x7d8   :  { %v4869_v4 = vpop.f32.mrb[9].mxu0 }
 0x7d9   :  { %v4195_v5 = vpack.i.bf16 %v4867_v3, %v4869_v4 }
 0x80c   :  { %v4873_v7 = vpop.f32.mrb[10].mxu0 }
 0x80d   :  { %v4875_v0 = vpop.f32.mrb[11].mxu0 }
 0x80e   :  { %v4200_v6 = vpack.i.bf16 %v4873_v7, %v4875_v0 }
 0x810   :  { %v3640_v8 = vpop.f32.mrb[12].mxu0 }
 0x811   :  { %v1210_v9 = vadd.f32 %v3640_v8, %v4702_v63  ;;  %v1204_v10 = vpop.f32.mrb[13].mxu0 }
 0x812   :  { %v1205_v56 = vadd.f32 %v1204_v10, %v4707_v1 }
 0x813   :  { %v1226_v11 = vsel %vm231_vm0, %v1210_v9, -inf }
 0x814   :  { %1227 = vmax.xlane.f32.xlu1 %v1226_v11  ;;  %v3643_v13 = vpop.f32.mrb[14].mxu0  ;;  %v1223_v14 = vsel %vm231_vm0, %v1205_v56, -inf }
 0x815   :  { %v1214_v15 = vpop.f32.mrb[15].mxu0  ;;  %1224 = vmax.xlane.f32.xlu0 %v1223_v14  ;;  %v1220_v39 = vadd.f32 %v3643_v13, %v4718_v12 }
 0x816   :  { %v1215_v38 = vadd.f32 %v1214_v15, %v4730_v25 }
 0x817   :  { %v1232_v41 = vsel %vm231_vm0, %v1220_v39, -inf }
 0x818   :  { %v1229_v40 = vsel %vm231_vm0, %v1215_v38, -inf }
 0x819   :  { %1230 = vmax.xlane.f32.xlu0 %v1229_v40 }
 0x81d   :  { %1233 = vmax.xlane.f32.xlu0 %v1232_v41 }
 0x825   :  { %4096 = vrot.lane.b32.xlu1 %v4649_v34, %s4463_s1 }
 0x829   :  { %4106 = vrot.lane.b32.xlu1 %v4649_v34, %s4464_s22 }
 0x8a1   :  { %v1228_v42 = vpop.xlane.xlu1 %1227 }
 0x8a2   :  { %v1236_v43 = vsub.f32 %v1210_v9, %v1228_v42  ;;  %v1225_v29 = vpop.xlane.xlu0 %1224 }
 0x8a3   :  { %v1235_v45 = vsub.f32 %v1205_v56, %v1225_v29 }
 0x8a4   :  { %v1241_v46 = vmul.f32 1.442695, %v1236_v43 }
 0x8a5   :  { %v1239_v47 = vmul.f32 1.442695, %v1235_v45  ;;  %v4097_v48 = vpop.permute.xlu1 %4096 }
 0x8a6   :  { %4329 = vpow2.f32 %v1241_v46  ;;  %v4099_v49 = vunpack.i.h.bf16 %v4097_v48  ;;  %v4098_v50 = vunpack.i.l.bf16 %v4097_v48  ;;  %v1231_v57 = vpop.xlane.xlu0 %1230 }
 0x8a7   :  { %4331 = vpow2.f32 %v1239_v47  ;;  %v1237_v60 = vsub.f32 %v1215_v38, %v1231_v57 }
 0x8a8   :  { %v3897_v51 = vpack.c.bf16 %v4099_v49, %v4098_v50 }
 0x8a9   :  { %v1243_v62 = vmul.f32 1.442695, %v1237_v60  ;;  %v4107_v56 = vpop.permute.xlu1 %4106 }
 0x8aa   :  { %3898 = vmatprep.subr.bf16.mxu1 %v3897_v51  ;;  %v1234_v58 = vpop.xlane.xlu0 %1233  ;;  %v4109_v15 = vunpack.i.h.bf16 %v4107_v56  ;;  %v4108_v38 = vunpack.i.l.bf16 %v4107_v56 }
 0x8ab   :  { %3900 = vmatpush3.bf16.msra.mxu1 %v3897_v51  ;;  %v1238_v59 = vsub.f32 %v1220_v39, %v1234_v58 }
 0x8ac   :  { %v3905_v42 = vpack.c.bf16 %v4109_v15, %v4108_v38 }
 0x8ad   :  { %v1245_v61 = vmul.f32 1.442695, %v1238_v59 }
 0x8af   :  { %4333 = vpow2.f32 %v1245_v61 }
 0x8b0   :  { %v4330_v52 = vpop.eup %4329  ;;  %4335 = vpow2.f32 %v1243_v62 }
 0x8b1   :  { %v4332_v53 = vpop.eup %4331  ;;  %v1250_v55 = vsel %vm231_vm0, %v4330_v52, 0.0 }
 0x8b2   :  { %1251 = vadd.xlane.f32.xlu0 %v1250_v55  ;;  %v1247_v54 = vsel %vm231_vm0, %v4332_v53, 0.0 }
 0x8b3   :  { %1248 = vadd.xlane.f32.xlu1 %v1247_v54 }
 0x8b9   :  { %v4334_v2 = vpop.eup %4333 }
 0x8ba   :  { %v4336_v8 = vpop.eup %4335  ;;  %v1256_v9 = vsel %vm231_vm0, %v4334_v2, 0.0 }
 0x8bb   :  { %v1253_v10 = vsel %vm231_vm0, %v4336_v8, 0.0 }
 0x8c4   :  { %4111 = vrot.lane.b32.xlu1 %v4645_v33, %s4464_s22  ;;  %s4473_s22 = smov 68  }
 0x8c8   :  { %4101 = vrot.lane.b32.xlu0 %v4645_v33, %s4463_s1  ;;  %s4472_s1 = smov 40  }
 0x8e7   :  { %1257 = vadd.xlane.f32.xlu0 %v1256_v9 }
 0x8e8   :  { %1254 = vadd.xlane.f32.xlu1 %v1253_v10 }
 0x8f9   :  { %1378 = vrot.lane.b32.xlu1 %v4655_v35, %s4465_s2 }
 0x8fd   :  { %1382 = vrot.lane.b32.xlu1 %v4659_v36, %s4465_s2  ;;  %1376 = vrot.lane.b32.xlu0 %v4643_v32, %s4465_s2 }
 0x901   :  { %1380 = vrot.lane.b32.xlu0 %v4661_v37, %s4465_s2  ;;  %s4474_s2 = smov 100  }
 0x93f   :  { %v1252_v11 = vpop.xlane.xlu0 %1251 }
 0x940   :  { %4337 = vrcp.f32 %v1252_v11  ;;  %v1249_v13 = vpop.xlane.xlu1 %1248 }
 0x941   :  { %4339 = vrcp.f32 %v1249_v13 }
 0x943   :  { %v4102_v14 = vpop.permute.xlu0 %4101 }
 0x944   :  { %v4104_v39 = vunpack.i.h.bf16 %v4102_v14  ;;  %v4103_v40 = vunpack.i.l.bf16 %v4102_v14  ;;  %v4112_v29 = vpop.permute.xlu1 %4111 }
 0x945   :  { %v4114_v48 = vunpack.i.h.bf16 %v4112_v29  ;;  %v4113_v49 = vunpack.i.l.bf16 %v4112_v29 }
 0x946   :  { %v3901_v41 = vpack.c.bf16 %v4104_v39, %v4103_v40 }
 0x947   :  { %v3911_v50 = vpack.c.bf16 %v4114_v48, %v4113_v49 }
 0x948   :  { %3902 = vmatprep.subr.bf16.mxu1 %v3901_v41 }
 0x949   :  { %3904 = vmatpush3.bf16.msra.mxu1 %v3901_v41 }
 0x94a   :  { %v4338_v43 = vpop.eup %4337  ;;  %3907 = vmatprep.subr.msk.bf16.mxu1 %vm4669_vm2, %v3905_v42 }
 0x94b   :  { %v4340_v45 = vpop.eup %4339  ;;  %v1264_v47 = vmul.f32 %v4338_v43, %v4330_v52 }
 0x94c   :  { %v1263_v46 = vmul.f32 %v4340_v45, %v4332_v53 }
 0x94e   :  { %3652 = vmatprep.mubr.msk.f32.mxu1 %vm231_vm0, %v1263_v46 }
 0x94f   :  { %3653 = vmatmul.mubr.msk.f32.vlgmr.msra.gmra.mrb[20].mxu1 %vm231_vm0, %v1264_v47 }
 0x952   :  { %3910 = vmatpush3.bf16.xpose.msk.msra.mxu1 %vm4669_vm2, %v3905_v42 }
 0x953   :  { %3913 = vmatprep.subr.msk.bf16.mxu1 %vm4669_vm2, %v3911_v50 }
 0x95a   :  { %3916 = vmatpush3.bf16.xpose.msk.msra.mxu1 %vm4669_vm2, %v3911_v50 }
 0x974   :  { %v1258_v51 = vpop.xlane.xlu0 %1257 }
 0x975   :  { %4341 = vrcp.f32 %v1258_v51  ;;  %v1255_v53 = vpop.xlane.xlu1 %1254 }
 0x976   :  { %4343 = vrcp.f32 %v1255_v53 }
 0x978   :  { %v1377_v57 = vpop.permute.xlu0 %1376 }
 0x979   :  { %v1379_v59 = vpop.permute.xlu1 %1378 }
 0x97c   :  { %v1381_v60 = vpop.permute.xlu0 %1380 }
 0x97d   :  { %v1383_v61 = vpop.permute.xlu1 %1382 }
 0x97f   :  { %v4342_v52 = vpop.eup %4341 }
 0x980   :  { %v4344_v55 = vpop.eup %4343  ;;  %v1266_v58 = vmul.f32 %v4342_v52, %v4334_v2 }
 0x981   :  { %v1265_v54 = vmul.f32 %v4344_v55, %v4336_v8 }
 0x983   :  { %3655 = vmatprep.mubr.msk.f32.mxu1 %vm231_vm0, %v1265_v54 }
 0x984   :  { %3656 = vmatmul.mubr.msk.f32.gmra.mrb[22].mxu1 %vm231_vm0, %v1266_v58 }
 0x985   :  { %3666 = vmatprep.mubr.msk.f32.mxu1 %vm307_vm1, %v1377_v57 }
 0x988   :  { %3667 = vmatmul.mubr.msk.f32.vlgmr.msra.gmra.mrb[24].mxu1 %vm307_vm1, %v1379_v59 }
 0x989   :  { %3669 = vmatprep.mubr.msk.f32.mxu1 %vm307_vm1, %v1381_v60 }
 0x98c   :  { %3670 = vmatmul.mubr.msk.f32.gmra.mrb[26].mxu1 %vm307_vm1, %v1383_v61 }
 0xa22   :  { %v4915_v62 = vpop.f32.mrb[20].mxu1 }
 0xa23   :  { %v4917_v8 = vpop.f32.mrb[21].mxu1 }
 0xa24   :  { %v4205_v2 = vpack.i.bf16 %v4915_v62, %v4917_v8 }
 0xa57   :  { %v4921_v9 = vpop.f32.mrb[22].mxu1 }
 0xa58   :  { %v4923_v10 = vpop.f32.mrb[23].mxu1 }
 0xa59   :  { %v4210_v56 = vpack.i.bf16 %v4921_v9, %v4923_v10 }
 0xa5b   :  { %v3668_v11 = vpop.f32.mrb[24].mxu1 }
 0xa5c   :  { %v1480_v13 = vadd.f32 %v3668_v11, %v4702_v63  ;;  %v1474_v14 = vpop.f32.mrb[25].mxu1 }
 0xa5d   :  { %v1475_v15 = vadd.f32 %v1474_v14, %v4707_v1 }
 0xa5e   :  { %v1496_v38 = vsel %vm231_vm0, %v1480_v13, -inf }
 0xa5f   :  { %1497 = vmax.xlane.f32.xlu1 %v1496_v38  ;;  %v3671_v39 = vpop.f32.mrb[26].mxu1  ;;  %v1493_v40 = vsel %vm231_vm0, %v1475_v15, -inf }
 0xa60   :  { %v1484_v41 = vpop.f32.mrb[27].mxu1  ;;  %1494 = vmax.xlane.f32.xlu0 %v1493_v40  ;;  %v1490_v43 = vadd.f32 %v3671_v39, %v4718_v12 }
 0xa61   :  { %v1485_v42 = vadd.f32 %v1484_v41, %v4730_v25 }
 0xa62   :  { %v1502_v63 = vsel %vm231_vm0, %v1490_v43, -inf }
 0xa63   :  { %v1499_v29 = vsel %vm231_vm0, %v1485_v42, -inf }
 0xa64   :  { %1500 = vmax.xlane.f32.xlu0 %v1499_v29 }
 0xa68   :  { %1503 = vmax.xlane.f32.xlu0 %v1502_v63 }
 0xa70   :  { %4116 = vrot.lane.b32.xlu1 %v4649_v34, %s4466_s23 }
 0xa74   :  { %4126 = vrot.lane.b32.xlu1 %v4649_v34, %s4467_s24 }
 0xaec   :  { %v1498_v1 = vpop.xlane.xlu1 %1497 }
 0xaed   :  { %v1506_v45 = vsub.f32 %v1480_v13, %v1498_v1  ;;  %v1495_v46 = vpop.xlane.xlu0 %1494 }
 0xaee   :  { %v1505_v47 = vsub.f32 %v1475_v15, %v1495_v46 }
 0xaef   :  { %v1511_v48 = vmul.f32 1.442695, %v1506_v45 }
 0xaf0   :  { %v1509_v25 = vmul.f32 1.442695, %v1505_v47  ;;  %v4117_v49 = vpop.permute.xlu1 %4116 }
 0xaf1   :  { %4345 = vpow2.f32 %v1511_v48  ;;  %v4119_v12 = vunpack.i.h.bf16 %v4117_v49  ;;  %v4118_v50 = vunpack.i.l.bf16 %v4117_v49  ;;  %v1501_v57 = vpop.xlane.xlu0 %1500 }
 0xaf2   :  { %4347 = vpow2.f32 %v1509_v25  ;;  %v1507_v60 = vsub.f32 %v1485_v42, %v1501_v57 }
 0xaf3   :  { %v3917_v51 = vpack.c.bf16 %v4119_v12, %v4118_v50 }
 0xaf4   :  { %v1513_v11 = vmul.f32 1.442695, %v1507_v60  ;;  %v4127_v39 = vpop.permute.xlu1 %4126 }
 0xaf5   :  { %3918 = vmatprep.subr.bf16.mxu0 %v3917_v51  ;;  %v1504_v58 = vpop.xlane.xlu0 %1503  ;;  %v4128_v29 = vunpack.i.l.bf16 %v4127_v39 }
 0xaf6   :  { %3920 = vmatpush3.bf16.msra.mxu0 %v3917_v51  ;;  %v1508_v59 = vsub.f32 %v1490_v43, %v1504_v58  ;;  %v4129_v43 = vunpack.i.h.bf16 %v4127_v39 }
 0xaf8   :  { %v1515_v61 = vmul.f32 1.442695, %v1508_v59  ;;  %v3925_v46 = vpack.c.bf16 %v4129_v43, %v4128_v29  ;;  %v4978_v43 = vld [vmem:[%s5315_s17 + $0x8] sm:$0xff] }
 0xafa   :  { %4349 = vpow2.f32 %v1515_v61 }
 0xafb   :  { %v4346_v53 = vpop.eup %4345  ;;  %4351 = vpow2.f32 %v1513_v11 }
 0xafc   :  { %v4348_v52 = vpop.eup %4347  ;;  %v1520_v55 = vsel %vm231_vm0, %v4346_v53, 0.0 }
 0xafd   :  { %1521 = vadd.xlane.f32.xlu0 %v1520_v55  ;;  %v1517_v54 = vsel %vm231_vm0, %v4348_v52, 0.0 }
 0xafe   :  { %1518 = vadd.xlane.f32.xlu1 %v1517_v54 }
 0xb04   :  { %v4350_v13 = vpop.eup %4349 }
 0xb05   :  { %v4352_v14 = vpop.eup %4351  ;;  %v1526_v15 = vsel %vm231_vm0, %v4350_v13, 0.0 }
 0xb06   :  { %v1523_v38 = vsel %vm231_vm0, %v4352_v14, 0.0 }
 0xb0f   :  { %4131 = vrot.lane.b32.xlu1 %v4645_v33, %s4467_s24  ;;  %s4476_s24 = smov 4  }
 0xb13   :  { %4121 = vrot.lane.b32.xlu0 %v4645_v33, %s4466_s23  ;;  %s4475_s23 = smov 36  }
 0xb32   :  { %1527 = vadd.xlane.f32.xlu0 %v1526_v15 }
 0xb33   :  { %1524 = vadd.xlane.f32.xlu1 %v1523_v38 }
 0xb44   :  { %1648 = vrot.lane.b32.xlu1 %v4655_v35, %s4468_s25 }
 0xb48   :  { %1652 = vrot.lane.b32.xlu1 %v4659_v36, %s4468_s25  ;;  %1646 = vrot.lane.b32.xlu0 %v4643_v32, %s4468_s25 }
 0xb4c   :  { %1650 = vrot.lane.b32.xlu0 %v4661_v37, %s4468_s25  ;;  %s4477_s25 = smov 8  }
 0xb8a   :  { %v1522_v40 = vpop.xlane.xlu0 %1521 }
 0xb8b   :  { %4353 = vrcp.f32 %v1522_v40  ;;  %v1519_v41 = vpop.xlane.xlu1 %1518 }
 0xb8c   :  { %4355 = vrcp.f32 %v1519_v41 }
 0xb8e   :  { %v4122_v42 = vpop.permute.xlu0 %4121 }
 0xb8f   :  { %v4124_v63 = vunpack.i.h.bf16 %v4122_v42  ;;  %v4123_v1 = vunpack.i.l.bf16 %v4122_v42  ;;  %v4132_v48 = vpop.permute.xlu1 %4131 }
 0xb90   :  { %v4134_v50 = vunpack.i.h.bf16 %v4132_v48  ;;  %v4133_v51 = vunpack.i.l.bf16 %v4132_v48 }
 0xb91   :  { %v3921_v45 = vpack.c.bf16 %v4124_v63, %v4123_v1  ;;  %v4984_v1 = vld [vmem:[%s5315_s17] sm:$0xff] }
 0xb92   :  { %v3931_v55 = vpack.c.bf16 %v4134_v50, %v4133_v51  ;;  %v4998_v50 = vld [vmem:[%s5315_s17 + $0x18] sm:$0xff] }
 0xb93   :  { %3922 = vmatprep.subr.bf16.mxu0 %v3921_v45 }
 0xb94   :  { %3924 = vmatpush3.bf16.msra.mxu0 %v3921_v45 }
 0xb95   :  { %v4354_v47 = vpop.eup %4353  ;;  %3927 = vmatprep.subr.msk.bf16.mxu0 %vm4669_vm2, %v3925_v46 }
 0xb96   :  { %v4356_v25 = vpop.eup %4355  ;;  %v1534_v12 = vmul.f32 %v4354_v47, %v4346_v53 }
 0xb97   :  { %v1533_v49 = vmul.f32 %v4356_v25, %v4348_v52 }
 0xb99   :  { %3680 = vmatprep.mubr.msk.f32.mxu0 %vm231_vm0, %v1533_v49  ;;  %v4992_v49 = vld [vmem:[%s5315_s17 + $0x10] sm:$0xff]  ;;  %s4471_s17 = smov 104  }
 0xb9a   :  { %3681 = vmatmul.mubr.msk.f32.vlgmr.msra.gmra.mrb[16].mxu0 %vm231_vm0, %v1534_v12 }
 0xb9d   :  { %3930 = vmatpush3.bf16.xpose.msk.msra.mxu0 %vm4669_vm2, %v3925_v46 }
 0xb9e   :  { %3933 = vmatprep.subr.msk.bf16.mxu0 %vm4669_vm2, %v3931_v55 }
 0xba5   :  { %3936 = vmatpush3.bf16.xpose.msk.msra.mxu0 %vm4669_vm2, %v3931_v55 }
 0xbbf   :  { %v1528_v54 = vpop.xlane.xlu0 %1527 }
 0xbc0   :  { %4357 = vrcp.f32 %v1528_v54  ;;  %v1525_v52 = vpop.xlane.xlu1 %1524 }
 0xbc1   :  { %4359 = vrcp.f32 %v1525_v52 }
 0xbc3   :  { %v1647_v59 = vpop.permute.xlu0 %1646 }
 0xbc4   :  { %v1649_v61 = vpop.permute.xlu1 %1648 }
 0xbc7   :  { %v1651_v11 = vpop.permute.xlu0 %1650 }
 0xbc8   :  { %v1653_v15 = vpop.permute.xlu1 %1652 }
 0xbca   :  { %v4358_v53 = vpop.eup %4357 }
 0xbcb   :  { %v4360_v57 = vpop.eup %4359  ;;  %v1536_v60 = vmul.f32 %v4358_v53, %v4350_v13 }
 0xbcc   :  { %v1535_v58 = vmul.f32 %v4360_v57, %v4352_v14 }
 0xbce   :  { %3683 = vmatprep.mubr.msk.f32.mxu0 %vm231_vm0, %v1535_v58 }
 0xbcf   :  { %3684 = vmatmul.mubr.msk.f32.gmra.mrb[18].mxu0 %vm231_vm0, %v1536_v60 }
 0xbd0   :  { %3694 = vmatprep.mubr.msk.f32.mxu0 %vm307_vm1, %v1647_v59 }
 0xbd3   :  { %3695 = vmatmul.mubr.msk.f32.vlgmr.msra.gmra.mrb[20].mxu0 %vm307_vm1, %v1649_v61 }
 0xbd4   :  { %3697 = vmatprep.mubr.msk.f32.mxu0 %vm307_vm1, %v1651_v11 }
 0xbd7   :  { %3698 = vmatmul.mubr.msk.f32.gmra.mrb[22].mxu0 %vm307_vm1, %v1653_v15 }
 0xc6d   :  { %v4963_v38 = vpop.f32.mrb[16].mxu0 }
 0xc6e   :  { %v4965_v14 = vpop.f32.mrb[17].mxu0 }
 0xca2   :  { %v4969_v39 = vpop.f32.mrb[18].mxu0 }
 0xca3   :  { %v4971_v40 = vpop.f32.mrb[19].mxu0 }
 0xca4   :  { %v4220_v41 = vpack.i.bf16 %v4969_v39, %v4971_v40  ;;  %v4267_v40 = vld [vmem:[%s5303_s5] sm:$0xff]  }
 0xca6   :  { %v3696_v42 = vpop.f32.mrb[20].mxu0 }
 0xca7   :  { %v1750_v29 = vadd.f32 %v4978_v43, %v3696_v42  ;;  %v1744_v63 = vpop.f32.mrb[21].mxu0 }
 0xca8   :  { %v1745_v45 = vadd.f32 %v4984_v1, %v1744_v63 }
 0xca9   :  { %v1766_v46 = vsel %vm231_vm0, %v1750_v29, -inf }
 0xcaa   :  { %1767 = vmax.xlane.f32.xlu1 %v1766_v46  ;;  %v3699_v47 = vpop.f32.mrb[22].mxu0  ;;  %v1763_v48 = vsel %vm231_vm0, %v1745_v45, -inf }
 0xcab   :  { %v1754_v25 = vpop.f32.mrb[23].mxu0  ;;  %1764 = vmax.xlane.f32.xlu0 %v1763_v48  ;;  %v1760_v51 = vadd.f32 %v4998_v50, %v3699_v47 }
 0xcac   :  { %v1755_v12 = vadd.f32 %v4992_v49, %v1754_v25 }
 0xcad   :  { %v1772_v54 = vsel %vm231_vm0, %v1760_v51, -inf }
 0xcae   :  { %v1769_v55 = vsel %vm231_vm0, %v1755_v12, -inf }
 0xcaf   :  { %1770 = vmax.xlane.f32.xlu0 %v1769_v55 }
 0xcb3   :  { %1773 = vmax.xlane.f32.xlu0 %v1772_v54 }
 0xcbb   :  { %4136 = vrot.lane.b32.xlu1 %v4649_v34, %s4469_s21 }
 0xcbf   :  { %4146 = vrot.lane.b32.xlu1 %v4649_v34, %s4470_s4 }
 0xd37   :  { %v1768_v52 = vpop.xlane.xlu1 %1767 }
 0xd38   :  { %v1776_v53 = vsub.f32 %v1750_v29, %v1768_v52  ;;  %v1765_v57 = vpop.xlane.xlu0 %1764 }
 0xd39   :  { %v1775_v58 = vsub.f32 %v1745_v45, %v1765_v57 }
 0xd3a   :  { %v1781_v59 = vmul.f32 1.442695, %v1776_v53 }
 0xd3b   :  { %v1779_v60 = vmul.f32 1.442695, %v1775_v58  ;;  %v4137_v61 = vpop.permute.xlu1 %4136 }
 0xd3c   :  { %4361 = vpow2.f32 %v1781_v59  ;;  %v4139_v11 = vunpack.i.h.bf16 %v4137_v61  ;;  %v4138_v15 = vunpack.i.l.bf16 %v4137_v61  ;;  %v1771_v29 = vpop.xlane.xlu0 %1770 }
 0xd3d   :  { %4363 = vpow2.f32 %v1779_v60  ;;  %v1777_v55 = vsub.f32 %v1755_v12, %v1771_v29 }
 0xd3e   :  { %v3937_v42 = vpack.c.bf16 %v4139_v11, %v4138_v15 }
 0xd3f   :  { %v1783_v52 = vmul.f32 1.442695, %v1777_v55  ;;  %v4147_v12 = vpop.permute.xlu1 %4146 }
 0xd40   :  { %3938 = vmatprep.subr.bf16.mxu1 %v3937_v42  ;;  %v1774_v45 = vpop.xlane.xlu0 %1773  ;;  %v4149_v11 = vunpack.i.h.bf16 %v4147_v12  ;;  %v4148_v15 = vunpack.i.l.bf16 %v4147_v12 }
 0xd41   :  { %3940 = vmatpush3.bf16.msra.mxu1 %v3937_v42  ;;  %v1778_v25 = vsub.f32 %v1760_v51, %v1774_v45 }
 0xd42   :  { %v3945_v29 = vpack.c.bf16 %v4149_v11, %v4148_v15 }
 0xd43   :  { %v1785_v54 = vmul.f32 1.442695, %v1778_v25 }
 0xd45   :  { %4365 = vpow2.f32 %v1785_v54 }
 0xd46   :  { %v4362_v63 = vpop.eup %4361  ;;  %4367 = vpow2.f32 %v1783_v52 }
 0xd47   :  { %v4364_v46 = vpop.eup %4363  ;;  %v1790_v47 = vsel %vm231_vm0, %v4362_v63, 0.0 }
 0xd48   :  { %1791 = vadd.xlane.f32.xlu0 %v1790_v47  ;;  %v1787_v48 = vsel %vm231_vm0, %v4364_v46, 0.0 }
 0xd49   :  { %1788 = vadd.xlane.f32.xlu1 %v1787_v48 }
 0xd4f   :  { %v4366_v53 = vpop.eup %4365 }
 0xd50   :  { %v4368_v57 = vpop.eup %4367  ;;  %v1796_v58 = vsel %vm231_vm0, %v4366_v53, 0.0 }
 0xd51   :  { %v1793_v59 = vsel %vm231_vm0, %v4368_v57, 0.0 }
 0xd5a   :  { %4151 = vrot.lane.b32.xlu1 %v4645_v33, %s4470_s4 }
 0xd5e   :  { %4141 = vrot.lane.b32.xlu0 %v4645_v33, %s4469_s21  ;;  %s4482_s21 = smov 28  }
 0xd7d   :  { %1797 = vadd.xlane.f32.xlu0 %v1796_v58 }
 0xd7e   :  { %1794 = vadd.xlane.f32.xlu1 %v1793_v59 }
 0xd8f   :  { %1918 = vrot.lane.b32.xlu1 %v4655_v35, %s4471_s17 }
 0xd93   :  { %1922 = vrot.lane.b32.xlu1 %v4659_v36, %s4471_s17  ;;  %1916 = vrot.lane.b32.xlu0 %v4643_v32, %s4471_s17 }
 0xd97   :  { %1920 = vrot.lane.b32.xlu0 %v4661_v37, %s4471_s17 }
 0xdd5   :  { %v1792_v51 = vpop.xlane.xlu0 %1791 }
 0xdd6   :  { %4369 = vrcp.f32 %v1792_v51  ;;  %v1789_v60 = vpop.xlane.xlu1 %1788 }
 0xdd7   :  { %4371 = vrcp.f32 %v1789_v60 }
 0xdd9   :  { %v4142_v61 = vpop.permute.xlu0 %4141 }
 0xdda   :  { %v4144_v42 = vunpack.i.h.bf16 %v4142_v61  ;;  %v4143_v47 = vunpack.i.l.bf16 %v4142_v61  ;;  %v4152_v25 = vpop.permute.xlu1 %4151 }
 0xddb   :  { %v4154_v58 = vunpack.i.h.bf16 %v4152_v25  ;;  %v4153_v59 = vunpack.i.l.bf16 %v4152_v25 }
 0xddc   :  { %v3941_v48 = vpack.c.bf16 %v4144_v42, %v4143_v47 }
 0xddd   :  { %v3951_v12 = vpack.c.bf16 %v4154_v58, %v4153_v59 }
 0xdde   :  { %3942 = vmatprep.subr.bf16.mxu1 %v3941_v48 }
 0xddf   :  { %3944 = vmatpush3.bf16.msra.mxu1 %v3941_v48 }
 0xde0   :  { %v4370_v45 = vpop.eup %4369  ;;  %3947 = vmatprep.subr.msk.bf16.mxu1 %vm4669_vm2, %v3945_v29 }
 0xde1   :  { %v4372_v55 = vpop.eup %4371  ;;  %v1804_v52 = vmul.f32 %v4370_v45, %v4362_v63 }
 0xde2   :  { %v1803_v54 = vmul.f32 %v4372_v55, %v4364_v46 }
 0xde4   :  { %3708 = vmatprep.mubr.msk.f32.mxu1 %vm231_vm0, %v1803_v54 }
 0xde5   :  { %3709 = vmatmul.mubr.msk.f32.vlgmr.msra.gmra.mrb[28].mxu1 %vm231_vm0, %v1804_v52 }
 0xde8   :  { %3950 = vmatpush3.bf16.xpose.msk.msra.mxu1 %vm4669_vm2, %v3945_v29 }
 0xde9   :  { %3953 = vmatprep.subr.msk.bf16.mxu1 %vm4669_vm2, %v3951_v12 }
 0xdf0   :  { %3956 = vmatpush3.bf16.xpose.msk.msra.mxu1 %vm4669_vm2, %v3951_v12 }
 0xe0a   :  { %v1798_v51 = vpop.xlane.xlu0 %1797 }
 0xe0b   :  { %4373 = vrcp.f32 %v1798_v51  ;;  %v1795_v46 = vpop.xlane.xlu1 %1794 }
 0xe0c   :  { %4375 = vrcp.f32 %v1795_v46 }
 0xe0e   :  { %v1917_v11 = vpop.permute.xlu0 %1916 }
 0xe0f   :  { %v1919_v42 = vpop.permute.xlu1 %1918 }
 0xe12   :  { %v1921_v47 = vpop.permute.xlu0 %1920 }
 0xe13   :  { %v1923_v48 = vpop.permute.xlu1 %1922 }
 0xe15   :  { %v4374_v63 = vpop.eup %4373 }
 0xe16   :  { %v4376_v60 = vpop.eup %4375  ;;  %v1806_v15 = vmul.f32 %v4374_v63, %v4366_v53 }
 0xe17   :  { %v1805_v61 = vmul.f32 %v4376_v60, %v4368_v57 }
 0xe19   :  { %3711 = vmatprep.mubr.msk.f32.mxu1 %vm231_vm0, %v1805_v61 }
 0xe1a   :  { %3712 = vmatmul.mubr.msk.f32.gmra.mrb[30].mxu1 %vm231_vm0, %v1806_v15 }
 0xe1b   :  { %3722 = vmatprep.mubr.msk.f32.mxu1 %vm307_vm1, %v1917_v11 }
 0xe1e   :  { %3723 = vmatmul.mubr.msk.f32.vlgmr.msra.gmra.mrb[32].mxu1 %vm307_vm1, %v1919_v42 }
 0xe1f   :  { %3725 = vmatprep.mubr.msk.f32.mxu1 %vm307_vm1, %v1921_v47 }
 0xe22   :  { %3726 = vmatmul.mubr.msk.f32.gmra.mrb[34].mxu1 %vm307_vm1, %v1923_v48 }
 0xeb8   :  { %v5031_v29 = vpop.f32.mrb[28].mxu1 }
 0xeb9   :  { %v5033_v57 = vpop.f32.mrb[29].mxu1 }
 0xeba   :  { %v5333_v23 = vpack.i.bf16 %v5031_v29, %v5033_v57 }
 0xeed   :  { %v5037_v45 = vpop.f32.mrb[30].mxu1 }
 0xeee   :  { %v5039_v25 = vpop.f32.mrb[31].mxu1 }
 0xef1   :  { %v3724_v54 = vpop.f32.mrb[32].mxu1 }
 0xef2   :  { %v2020_v52 = vadd.f32 %v4978_v43, %v3724_v54  ;;  %v2014_v58 = vpop.f32.mrb[33].mxu1 }
 0xef3   :  { %v2015_v59 = vadd.f32 %v4984_v1, %v2014_v58 }
 0xef4   :  { %v2036_v12 = vsel %vm231_vm0, %v2020_v52, -inf }
 0xef5   :  { %2037 = vmax.xlane.f32.xlu1 %v2036_v12  ;;  %v3727_v51 = vpop.f32.mrb[34].mxu1  ;;  %v2033_v46 = vsel %vm231_vm0, %v2015_v59, -inf }
 0xef6   :  { %v2024_v63 = vpop.f32.mrb[35].mxu1  ;;  %2034 = vmax.xlane.f32.xlu0 %v2033_v46  ;;  %v2030_v61 = vadd.f32 %v4998_v50, %v3727_v51 }
 0xef7   :  { %v2025_v60 = vadd.f32 %v4992_v49, %v2024_v63 }
 0xef8   :  { %v2042_v15 = vsel %vm231_vm0, %v2030_v61, -inf }
 0xef9   :  { %v2039_v11 = vsel %vm231_vm0, %v2025_v60, -inf }
 0xefa   :  { %2040 = vmax.xlane.f32.xlu0 %v2039_v11 }
 0xefe   :  { %2043 = vmax.xlane.f32.xlu0 %v2042_v15 }
 0xf06   :  { %4156 = vrot.lane.b32.xlu1 %v4649_v34, %s4472_s1 }
 0xf0a   :  { %4166 = vrot.lane.b32.xlu1 %v4649_v34, %s4473_s22 }
 0xf0e   :  { %4171 = vrot.lane.b32.xlu1 %v4645_v33, %s4473_s22 }
 0xf82   :  { %v2038_v42 = vpop.xlane.xlu1 %2037 }
 0xf83   :  { %v2046_v47 = vsub.f32 %v2020_v52, %v2038_v42  ;;  %v2035_v48 = vpop.xlane.xlu0 %2034 }
 0xf84   :  { %v2045_v54 = vsub.f32 %v2015_v59, %v2035_v48 }
 0xf85   :  { %v2051_v58 = vmul.f32 1.442695, %v2046_v47 }
 0xf86   :  { %v2049_v12 = vmul.f32 1.442695, %v2045_v54  ;;  %v4157_v51 = vpop.permute.xlu1 %4156 }
 0xf87   :  { %4377 = vpow2.f32 %v2051_v58  ;;  %v4159_v46 = vunpack.i.h.bf16 %v4157_v51  ;;  %v4158_v63 = vunpack.i.l.bf16 %v4157_v51  ;;  %v2041_v52 = vpop.xlane.xlu0 %2040 }
 0xf88   :  { %4379 = vpow2.f32 %v2049_v12  ;;  %v2047_v47 = vsub.f32 %v2025_v60, %v2041_v52 }
 0xf89   :  { %v3957_v11 = vpack.c.bf16 %v4159_v46, %v4158_v63 }
 0xf8a   :  { %v2053_v54 = vmul.f32 1.442695, %v2047_v47 }
 0xf8b   :  { %3958 = vmatprep.subr.bf16.mxu0 %v3957_v11  ;;  %v2044_v59 = vpop.xlane.xlu0 %2043 }
 0xf8c   :  { %3960 = vmatpush3.bf16.msra.mxu0 %v3957_v11  ;;  %v2048_v42 = vsub.f32 %v2030_v61, %v2044_v59 }
 0xf8e   :  { %v2055_v48 = vmul.f32 1.442695, %v2048_v42 }
 0xf90   :  { %4381 = vpow2.f32 %v2055_v48 }
 0xf91   :  { %v4378_v15 = vpop.eup %4377  ;;  %4383 = vpow2.f32 %v2053_v54 }
 0xf92   :  { %v4380_v53 = vpop.eup %4379  ;;  %v2060_v55 = vsel %vm231_vm0, %v4378_v15, 0.0 }
 0xf93   :  { %2061 = vadd.xlane.f32.xlu0 %v2060_v55  ;;  %v2057_v13 = vsel %vm231_vm0, %v4380_v53, 0.0 }
 0xf94   :  { %2058 = vadd.xlane.f32.xlu1 %v2057_v13 }
 0xf9a   :  { %v4382_v58 = vpop.eup %4381 }
 0xf9b   :  { %v4384_v12 = vpop.eup %4383  ;;  %v2066_v55 = vsel %vm231_vm0, %v4382_v58, 0.0 }
 0xf9c   :  { %v2063_v13 = vsel %vm231_vm0, %v4384_v12, 0.0 }
 0xfa5   :  { %2188 = vrot.lane.b32.xlu1 %v4655_v35, %s4474_s2  ;;  %v4167_v35 = vpop.permute.xlu1 %4166 }
 0xfa6   :  { %v4169_v63 = vunpack.i.h.bf16 %v4167_v35  ;;  %v4168_v11 = vunpack.i.l.bf16 %v4167_v35 }
 0xfa8   :  { %v3965_v47 = vpack.c.bf16 %v4169_v63, %v4168_v11 }
 0xfa9   :  { %4161 = vrot.lane.b32.xlu0 %v4645_v33, %s4472_s1  ;;  %v4172_v60 = vpop.permute.xlu1 %4171 }
 0xfaa   :  { %v4174_v48 = vunpack.i.h.bf16 %v4172_v60  ;;  %v4173_v54 = vunpack.i.l.bf16 %v4172_v60 }
 0xfc8   :  { %2067 = vadd.xlane.f32.xlu0 %v2066_v55 }
 0xfc9   :  { %2064 = vadd.xlane.f32.xlu1 %v2063_v13  ;;  %v3971_v13 = vpack.c.bf16 %v4174_v48, %v4173_v54 }
 0xfda   :  { %2192 = vrot.lane.b32.xlu1 %v4659_v36, %s4474_s2 }
 0xfde   :  { %2186 = vrot.lane.b32.xlu0 %v4643_v32, %s4474_s2 }
 0xfe2   :  { %2190 = vrot.lane.b32.xlu0 %v4661_v37, %s4474_s2 }
0x1020   :  { %v2062_v61 = vpop.xlane.xlu0 %2061 }
0x1021   :  { %4385 = vrcp.f32 %v2062_v61  ;;  %v2059_v51 = vpop.xlane.xlu1 %2058 }
0x1022   :  { %4387 = vrcp.f32 %v2059_v51 }
0x1024   :  { %v4162_v46 = vpop.permute.xlu0 %4161 }
0x1025   :  { %v4164_v52 = vunpack.i.h.bf16 %v4162_v46  ;;  %v4163_v59 = vunpack.i.l.bf16 %v4162_v46  ;;  %v2189_v35 = vpop.permute.xlu1 %2188 }
0x1027   :  { %v3961_v42 = vpack.c.bf16 %v4164_v52, %v4163_v59 }
0x1029   :  { %3962 = vmatprep.subr.bf16.mxu0 %v3961_v42 }
0x102a   :  { %3964 = vmatpush3.bf16.msra.mxu0 %v3961_v42 }
0x102b   :  { %v4386_v36 = vpop.eup %4385  ;;  %3967 = vmatprep.subr.msk.bf16.mxu0 %vm4669_vm2, %v3965_v47 }
0x102c   :  { %v4388_v32 = vpop.eup %4387  ;;  %v2074_v55 = vmul.f32 %v4386_v36, %v4378_v15 }
0x102d   :  { %v2073_v37 = vmul.f32 %v4388_v32, %v4380_v53 }
0x102f   :  { %3736 = vmatprep.mubr.msk.f32.mxu0 %vm231_vm0, %v2073_v37 }
0x1030   :  { %3737 = vmatmul.mubr.msk.f32.vlgmr.msra.gmra.mrb[24].mxu0 %vm231_vm0, %v2074_v55 }
0x1033   :  { %3970 = vmatpush3.bf16.xpose.msk.msra.mxu0 %vm4669_vm2, %v3965_v47 }
0x1034   :  { %3973 = vmatprep.subr.msk.bf16.mxu0 %vm4669_vm2, %v3971_v13 }
0x103b   :  { %3976 = vmatpush3.bf16.xpose.msk.msra.mxu0 %vm4669_vm2, %v3971_v13 }
0x1055   :  { %v2068_v61 = vpop.xlane.xlu0 %2067 }
0x1056   :  { %4389 = vrcp.f32 %v2068_v61  ;;  %v2065_v53 = vpop.xlane.xlu1 %2064 }
0x1057   :  { %4391 = vrcp.f32 %v2065_v53 }
0x1059   :  { %v2187_v46 = vpop.permute.xlu0 %2186 }
0x105a   :  { %v2193_v44 = vpop.permute.xlu1 %2192 }
0x105d   :  { %v2191_v11 = vpop.permute.xlu0 %2190 }
0x1060   :  { %v4390_v15 = vpop.eup %4389 }
0x1061   :  { %v4392_v60 = vpop.eup %4391  ;;  %v2076_v63 = vmul.f32 %v4390_v15, %v4382_v58 }
0x1062   :  { %v2075_v51 = vmul.f32 %v4392_v60, %v4384_v12 }
0x1064   :  { %3739 = vmatprep.mubr.msk.f32.mxu0 %vm231_vm0, %v2075_v51 }
0x1065   :  { %3740 = vmatmul.mubr.msk.f32.gmra.mrb[26].mxu0 %vm231_vm0, %v2076_v63 }
0x1066   :  { %3750 = vmatprep.mubr.msk.f32.mxu0 %vm307_vm1, %v2187_v46 }
0x1069   :  { %3751 = vmatmul.mubr.msk.f32.vlgmr.msra.gmra.mrb[28].mxu0 %vm307_vm1, %v2189_v35 }
0x106a   :  { %3753 = vmatprep.mubr.msk.f32.mxu0 %vm307_vm1, %v2191_v11 }
0x106d   :  { %3754 = vmatmul.mubr.msk.f32.gmra.mrb[30].mxu0 %vm307_vm1, %v2193_v44 }
0x1103   :  { %v5079_v52 = vpop.f32.mrb[24].mxu0 }
0x1104   :  { %v5081_v59 = vpop.f32.mrb[25].mxu0 }
0x1105   :  { %v4235_v58 = vpack.i.bf16 %v5079_v52, %v5081_v59 }
0x1138   :  { %v5085_v12 = vpop.f32.mrb[26].mxu0 }
0x1139   :  { %v5087_v42 = vpop.f32.mrb[27].mxu0 }
0x113a   :  { %v4240_v47 = vpack.i.bf16 %v5085_v12, %v5087_v42 }
0x113c   :  { %v3752_v36 = vpop.f32.mrb[28].mxu0 }
0x113d   :  { %v2290_v32 = vadd.f32 %v4978_v43, %v3752_v36  ;;  %v2284_v37 = vpop.f32.mrb[29].mxu0 }
0x113e   :  { %v2285_v48 = vadd.f32 %v4984_v1, %v2284_v37 }
0x113f   :  { %v2306_v54 = vsel %vm231_vm0, %v2290_v32, -inf }
0x1140   :  { %2307 = vmax.xlane.f32.xlu1 %v2306_v54  ;;  %v3755_v55 = vpop.f32.mrb[30].mxu0  ;;  %v2303_v13 = vsel %vm231_vm0, %v2285_v48, -inf }
0x1141   :  { %v2294_v35 = vpop.f32.mrb[31].mxu0  ;;  %2304 = vmax.xlane.f32.xlu0 %v2303_v13  ;;  %v2300_v53 = vadd.f32 %v4998_v50, %v3755_v55 }
0x1142   :  { %v2295_v61 = vadd.f32 %v4992_v49, %v2294_v35 }
0x1143   :  { %v2312_v43 = vsel %vm231_vm0, %v2300_v53, -inf }
0x1144   :  { %v2309_v15 = vsel %vm231_vm0, %v2295_v61, -inf }
0x1145   :  { %2310 = vmax.xlane.f32.xlu0 %v2309_v15 }
0x1149   :  { %2313 = vmax.xlane.f32.xlu0 %v2312_v43 }
0x11cd   :  { %v2308_v60 = vpop.xlane.xlu1 %2307 }
0x11ce   :  { %v2316_v1 = vsub.f32 %v2290_v32, %v2308_v60  ;;  %v2305_v51 = vpop.xlane.xlu0 %2304 }
0x11cf   :  { %v2315_v46 = vsub.f32 %v2285_v48, %v2305_v51 }
0x11d0   :  { %v2321_v63 = vmul.f32 1.442695, %v2316_v1 }
0x11d1   :  { %v2319_v11 = vmul.f32 1.442695, %v2315_v46 }
0x11d2   :  { %4393 = vpow2.f32 %v2321_v63  ;;  %v2311_v44 = vpop.xlane.xlu0 %2310 }
0x11d3   :  { %4395 = vpow2.f32 %v2319_v11  ;;  %v2317_v36 = vsub.f32 %v2295_v61, %v2311_v44 }
0x11d5   :  { %v2323_v37 = vmul.f32 1.442695, %v2317_v36 }
0x11d6   :  { %v2314_v49 = vpop.xlane.xlu0 %2313 }
0x11d7   :  { %4397 = vpow2.f32 %v2323_v37  ;;  %v2318_v50 = vsub.f32 %v2300_v53, %v2314_v49 }
0x11d9   :  { %v2325_v54 = vmul.f32 1.442695, %v2318_v50 }
0x11db   :  { %4399 = vpow2.f32 %v2325_v54 }
0x11dc   :  { %v4394_v55 = vpop.eup %4393 }
0x11dd   :  { %v4396_v13 = vpop.eup %4395  ;;  %v2330_v35 = vsel %vm231_vm0, %v4394_v55, 0.0 }
0x11de   :  { %2331 = vadd.xlane.f32.xlu0 %v2330_v35  ;;  %v2327_v32 = vsel %vm231_vm0, %v4396_v13, 0.0 }
0x11df   :  { %2328 = vadd.xlane.f32.xlu1 %v2327_v32 }
0x11e1   :  { %v4398_v48 = vpop.eup %4397 }
0x11e2   :  { %v2333_v15 = vsel %vm231_vm0, %v4398_v48, 0.0 }
0x11e3   :  { %2334 = vadd.xlane.f32.xlu1 %v2333_v15 }
0x11e5   :  { %v4400_v43 = vpop.eup %4399 }
0x11e6   :  { %v2336_v61 = vsel %vm231_vm0, %v4400_v43, 0.0 }
0x11e7   :  { %2337 = vadd.xlane.f32.xlu0 %v2336_v61 }
0x11f4   :  { %4176 = vrot.lane.b32.xlu1 %v4649_v34, %s4475_s23  ;;  %v5332_v34 = vpack.i.bf16 %v5037_v45, %v5039_v25 }
0x11f8   :  { %4186 = vrot.lane.b32.xlu1 %v4185_v27, %s4476_s24 }
0x11fc   :  { %4191 = vrot.lane.b32.xlu1 %v4190_v31, %s4476_s24 }
0x11fd   :  { %4181 = vrot.lane.b32.xlu0 %v4645_v33, %s4475_s23  ;;  %v5331_v33 = vpack.i.bf16 %v4963_v38, %v4965_v14 }
0x1200   :  { %4201 = vrot.lane.b32.xlu1 %v4200_v6, %s4477_s25 }
0x1201   :  { %4196 = vrot.lane.b32.xlu0 %v4195_v5, %s4477_s25 }
0x1204   :  { %4211 = vrot.lane.b32.xlu1 %v4210_v56, %s4478_s3 }
0x1205   :  { %4206 = vrot.lane.b32.xlu0 %v4205_v2, %s4478_s3 }
0x1208   :  { %4221 = vrot.lane.b32.xlu1 %v4220_v41, %s4479_s27  ;;  %v4268_v41 = vld [vmem:[%s5303_s5 + $0x8] sm:$0xff]  }
0x1209   :  { %4216 = vrot.lane.b32.xlu0 %v5331_v33, %s4479_s27 }
0x120c   :  { %4231 = vrot.lane.b32.xlu1 %v5332_v34, %s4480_s28 }
0x120d   :  { %4226 = vrot.lane.b32.xlu0 %v5333_v23, %s4480_s28 }
0x1210   :  { %4241 = vrot.lane.b32.xlu1 %v4240_v47, %s4481_s20 }
0x1211   :  { %4236 = vrot.lane.b32.xlu0 %v4235_v58, %s4481_s20  ;;  %s4486_s20 = smov [#allocation3]  }
0x1212   :  { %s3202_s29 = sshll.u32 %s4486_s20, 4  ;;  %s3203_s29 = int_to_ptr.vmem [resolvable:$true] %s3202_s29 }
0x1213   :  { %p4434_p1 = scmp.lt.s32.totalorder %s3203_s29, %s3203_s29 }
0x126b   :  { %v2332_v27 = vpop.xlane.xlu0 %2331 }
0x126c   :  { %v2329_v26 = vpop.xlane.xlu1 %2328 }
0x126d   :  { %4401 = vrcp.f32 %v2329_v26 }
0x126e   :  { %4403 = vrcp.f32 %v2332_v27 }
0x1270   :  { %v2335_v28 = vpop.xlane.xlu1 %2334 }
0x1271   :  { %4405 = vrcp.f32 %v2335_v28 }
0x1274   :  { %v4177_v30 = vpop.permute.xlu1 %4176  ;;  %v2338_v31 = vpop.xlane.xlu0 %2337 }
0x1275   :  { %v4179_v3 = vunpack.i.h.bf16 %v4177_v30  ;;  %v4178_v4 = vunpack.i.l.bf16 %v4177_v30  ;;  %4407 = vrcp.f32 %v2338_v31 }
0x1277   :  { %v4402_v5 = vpop.eup %4401  ;;  %v3977_v7 = vpack.c.bf16 %v4179_v3, %v4178_v4 }
0x1278   :  { %v4182_v0 = vpop.permute.xlu0 %4181  ;;  %v2343_v6 = vmul.f32 %v4402_v5, %v4396_v13  ;;  %v4404_v9 = vpop.eup %4403 }
0x1279   :  { %v4184_v62 = vunpack.i.h.bf16 %v4182_v0  ;;  %v4183_v8 = vunpack.i.l.bf16 %v4182_v0  ;;  %3978 = vmatprep.subr.bf16.mxu1 %v3977_v7  ;;  %v2344_v56 = vmul.f32 %v4404_v9, %v4394_v55  ;;  %v4187_v58 = vpop.permute.xlu1 %4186 }
0x127a   :  { %3980 = vmatpush3.bf16.msra.mxu1 %v3977_v7  ;;  %3764 = vmatprep.mubr.msk.f32.mxu1 %vm231_vm0, %v2343_v6  ;;  %v4189_v63 = vunpack.i.h.bf16 %v4187_v58  ;;  %v4188_v11 = vunpack.i.l.bf16 %v4187_v58 }
0x127b   :  { %v3981_v2 = vpack.c.bf16 %v4184_v62, %v4183_v8  ;;  %v4406_v10 = vpop.eup %4405 }
0x127c   :  { %v2345_v14 = vmul.f32 %v4406_v10, %v4398_v48  ;;  %v4197_v42 = vpop.permute.xlu0 %4196  ;;  %v2569_v35 = vsel %vm307_vm1, %v4811_v21, %v4189_v63  ;;  %v2568_v48 = vsel %vm307_vm1, %v4813_v22, %v4188_v11 }
0x127d   :  { %3982 = vmatprep.subr.bf16.mxu1 %v3981_v2  ;;  %v4192_v12 = vpop.permute.xlu1 %4191  ;;  %v4198_v37 = vunpack.i.l.bf16 %v4197_v42  ;;  %v4199_v49 = vunpack.i.h.bf16 %v4197_v42 }
0x127e   :  { %3984 = vmatpush3.bf16.msra.mxu1 %v3981_v2  ;;  %v4194_v44 = vunpack.i.h.bf16 %v4192_v12  ;;  %v4193_v36 = vunpack.i.l.bf16 %v4192_v12 }
0x127f   :  { %v4408_v38 = vpop.eup %4407  ;;  %3770 = vmatprep.subr.bf16.mxu1 %v4267_v40  ;;  %v2573_v23 = vsel %vm2572_vm3, %v2568_v48, %v4198_v37  ;;  %v2574_v21 = vsel %vm2572_vm3, %v2569_v35, %v4199_v49 }
0x1280   :  { %v2346_v39 = vmul.f32 %v4408_v38, %v4400_v43  ;;  %v4207_v53 = vpop.permute.xlu0 %4206  ;;  %v2571_v15 = vsel %vm307_vm1, %v4815_v17, %v4194_v44  ;;  %v2570_v34 = vsel %vm307_vm1, %v4817_v24, %v4193_v36  ;;  %v3322_v36 = vld [vmem:[%s5304_s6] ss:$0 sm:$0xff] }
0x1281   :  { %3765 = vmatmul.mubr.msk.f32.vlgmr.msra.gmra.mrb[36].mxu1 %vm231_vm0, %v2344_v56  ;;  %v4202_v47 = vpop.permute.xlu1 %4201  ;;  %v4208_v55 = vunpack.i.l.bf16 %v4207_v53  ;;  %v4209_v32 = vunpack.i.h.bf16 %v4207_v53 }
0x1282   :  { %3767 = vmatprep.mubr.msk.f32.mxu1 %vm231_vm0, %v2345_v14  ;;  %3771 = vmatpush3.bf16.msra.mxu1 %v4267_v40  ;;  %v4204_v50 = vunpack.i.h.bf16 %v4202_v47  ;;  %v4203_v54 = vunpack.i.l.bf16 %v4202_v47 }
0x1283   :  { %3772 = vmatprep.subr.bf16.mxu1 %v4268_v41  ;;  %v2578_v22 = vsel %vm2577_vm4, %v2573_v23, %v4208_v55  ;;  %v2579_v17 = vsel %vm2577_vm4, %v2574_v21, %v4209_v32 }
0x1284   :  { %v4217_v1 = vpop.permute.xlu0 %4216  ;;  %v2575_v28 = vsel %vm2572_vm3, %v2570_v34, %v4203_v54  ;;  %v2576_v30 = vsel %vm2572_vm3, %v2571_v15, %v4204_v50 }
0x1285   :  { %3768 = vmatmul.mubr.msk.f32.gmra.mrb[38].mxu1 %vm231_vm0, %v2346_v39  ;;  %v4212_v60 = vpop.permute.xlu1 %4211  ;;  %v4219_v43 = vunpack.i.h.bf16 %v4217_v1  ;;  %v4218_v61 = vunpack.i.l.bf16 %v4217_v1 }
0x1286   :  { %3773 = vmatpush3.bf16.msra.mxu1 %v4268_v41  ;;  %v4214_v31 = vunpack.i.h.bf16 %v4212_v60  ;;  %v4213_v5 = vunpack.i.l.bf16 %v4212_v60 }
0x1287   :  { %v2583_v24 = vsel %vm2582_vm5, %v2578_v22, %v4218_v61  ;;  %v2584_v7 = vsel %vm2582_vm5, %v2579_v17, %v4219_v43 }
0x1288   :  { %v4227_v46 = vpop.permute.xlu0 %4226 }
0x1289   :  { %v4222_v51 = vpop.permute.xlu1 %4221  ;;  %v4229_v26 = vunpack.i.h.bf16 %v4227_v46  ;;  %v4228_v27 = vunpack.i.l.bf16 %v4227_v46 }
0x128a   :  { %v4224_v0 = vunpack.i.h.bf16 %v4222_v51  ;;  %v4223_v62 = vunpack.i.l.bf16 %v4222_v51 }
0x128b   :  { %v2588_v8 = vsel %vm2587_vm6, %v2583_v24, %v4228_v27  ;;  %v2589_v2 = vsel %vm2587_vm6, %v2584_v7, %v4229_v26 }
0x128c   :  { %v4237_v33 = vpop.permute.xlu0 %4236 }
0x128d   :  { %v4232_v13 = vpop.permute.xlu1 %4231  ;;  %v4239_v3 = vunpack.i.h.bf16 %v4237_v33  ;;  %v4238_v4 = vunpack.i.l.bf16 %v4237_v33 }
0x128e   :  { %v4234_v10 = vunpack.i.h.bf16 %v4232_v13  ;;  %v4233_v56 = vunpack.i.l.bf16 %v4232_v13 }
0x128f   :  { %v2593_v39 = vsel %vm2592_vm7, %v2588_v8, %v4238_v4  ;;  %v2594_v40 = vsel %vm2592_vm7, %v2589_v2, %v4239_v3  ;;  %v4269_v2 = vld [vmem:[%s5307_s9] sm:$0xff]  }
0x1290   :  { %3778 = vmatprep.subr.bf16.mxu0 %v4269_v2 }
0x1291   :  { %v4242_v6 = vpop.permute.xlu1 %4241  ;;  %3779 = vmatpush3.bf16.msra.mxu0 %v4269_v2 }
0x1292   :  { %v4244_v41 = vunpack.i.h.bf16 %v4242_v6 }
0x1354   :  { %v3766_v29 = vpop.f32.mrb[36].mxu1 }
0x1355   :  { %v2437_v57 = vpop.f32.mrb[37].mxu1 }
0x1356   :  { %v4245_v45 = vpack.i.bf16 %v3766_v29, %v2437_v57  ;;  %v4243_v29 = vunpack.i.l.bf16 %v4242_v6  ;;  %v2580_v57 = vsel %vm2577_vm4, %v2575_v28, %v4213_v5 }
0x1358   :  { %4246 = vrot.lane.b32.xlu0 %v4245_v45, %s4482_s21  ;;  %v3769_v25 = vpop.f32.mrb[38].mxu1  ;;  %v2581_v45 = vsel %vm2577_vm4, %v2576_v30, %v4214_v31 }
0x1359   :  { %v2447_v52 = vpop.f32.mrb[39].mxu1  ;;  %v2586_v58 = vsel %vm2582_vm5, %v2581_v45, %v4224_v0 }
0x135a   :  { %v4250_v59 = vpack.i.bf16 %v3769_v25, %v2447_v52  ;;  %v2591_v53 = vsel %vm2587_vm6, %v2586_v58, %v4234_v10  ;;  %v4271_v10 = vld [vmem:[%s5309_s11] sm:$0xff]  }
0x135b   :  { %v2596_v46 = vsel %vm2592_vm7, %v2591_v53, %v4244_v41  ;;  %3786 = vmatprep.subr.bf16.mxu1 %v4271_v10 }
0x135c   :  { %4251 = vrot.lane.b32.xlu1 %v4250_v59, %s4482_s21  ;;  %v2585_v59 = vsel %vm2582_vm5, %v2580_v57, %v4223_v62 }
0x135d   :  { %v2590_v47 = vsel %vm2587_vm6, %v2585_v59, %v4233_v56  ;;  %v4272_v56 = vld [vmem:[%s5309_s11 + $0x8] sm:$0xff]  }
0x135e   :  { %v2595_v51 = vsel %vm2592_vm7, %v2590_v47, %v4243_v29 }
0x13ca   :  { %v4247_v9 = vpop.permute.xlu0 %4246 }
0x13cb   :  { %v4249_v38 = vunpack.i.h.bf16 %v4247_v9  ;;  %v4248_v14 = vunpack.i.l.bf16 %v4247_v9  ;;  %v4270_v9 = vld [vmem:[%s5307_s9 + $0x8] sm:$0xff]  }
0x13cc   :  { %3780 = vmatprep.subr.bf16.mxu0 %v4270_v9 }
0x13cd   :  { %v2599_v25 = vsel %vm2597_vm8, %v2594_v40, %v4249_v38  ;;  %v2598_v52 = vsel %vm2597_vm8, %v2593_v39, %v4248_v14  ;;  %3781 = vmatpush3.bf16.msra.mxu0 %v4270_v9  ;;  %v4273_v38 = vld [vmem:[%s5309_s11 + $0x10] sm:$0xff]   ;;  %v4274_v14 = vld [vmem:[%s5309_s11 + $0x18] sm:$0xff]   ;;  %v4275_v39 = vld [vmem:[%s5309_s11 + $0x20] sm:$0xff]  }
0x13ce   :  { %v2602_v12 = vpack.c.bf16 %v2599_v25, %v2598_v52  ;;  %v4252_v42 = vpop.permute.xlu1 %4251  ;;  %v4276_v40 = vld [vmem:[%s5309_s11 + $0x28] sm:$0xff]  }
0x13cf   :  { %v4254_v60 = vunpack.i.h.bf16 %v4252_v42  ;;  %v4253_v1 = vunpack.i.l.bf16 %v4252_v42 }
0x13d0   :  { %3774 = vmatprep.mubr.msk.bf16.mxu1 %vm231_vm0, %v2602_v12 }
0x13d1   :  { %v2601_v63 = vsel %vm2597_vm8, %v2596_v46, %v4254_v60  ;;  %v2600_v11 = vsel %vm2597_vm8, %v2595_v51, %v4253_v1  ;;  %v3327_v1 = vld [vmem:[%s5305_s7] ss:$0 sm:$0xff] }
0x13d2   :  { %v2603_v44 = vpack.c.bf16 %v2601_v63, %v2600_v11 }
0x13d4   :  { %3775 = vmatmul.mubr.msk.bf16.vlgmr.msra.gmra.mrb[40].mxu1 %vm231_vm0, %v2603_v44 }
0x13d5   :  { %3787 = vmatpush3.bf16.msra.mxu1 %v4271_v10 }
0x13d6   :  { %3788 = vmatprep.subr.bf16.mxu1 %v4272_v56 }
0x13d9   :  { %3789 = vmatpush3.bf16.msra.mxu1 %v4272_v56 }
0x13da   :  { %3790 = vmatprep.subr.bf16.mxu1 %v4273_v38 }
0x13dd   :  { %3791 = vmatpush3.bf16.msra.mxu1 %v4273_v38 }
0x13de   :  { %3792 = vmatprep.subr.bf16.mxu1 %v4274_v14 }
0x13e1   :  { %3793 = vmatpush3.bf16.msra.mxu1 %v4274_v14 }
0x13e2   :  { %3794 = vmatprep.subr.bf16.mxu1 %v4275_v39 }
0x13e5   :  { %3795 = vmatpush3.bf16.msra.mxu1 %v4275_v39 }
0x13e6   :  { %3796 = vmatprep.subr.bf16.mxu1 %v4276_v40 }
0x13e9   :  { %3797 = vmatpush3.bf16.msra.mxu1 %v4276_v40 }
0x14a7   :  { %v3776_v37 = vpop.f32.mrb[40].mxu1 }
0x14a8   :  { %v2667_v49 = vpop.f32.mrb[41].mxu1  ;;  %v2676_v50 = vadd.f32 %v3776_v37, %v3322_v36 }
0x14a9   :  { %v2668_v54 = vadd.f32 %v3322_v36, %v2667_v49  ;;  %v3777_v55 = vpop.f32.mrb[42].mxu1 }
0x14aa   :  { %v2670_v13 = vpop.f32.mrb[43].mxu1  ;;  %v2684_v48 = vadd.f32 %v2676_v50, %v4632_v20  ;;  %v2679_v15 = vadd.f32 %v3777_v55, %v3322_v36 }
0x14ab   :  { %v2682_v35 = vadd.f32 %v2668_v54, %v4628_v18  ;;  %v2671_v32 = vadd.f32 %v3322_v36, %v2670_v13  ;;  %v3328_v36 = vld [vmem:[%s5306_s8] ss:$0 sm:$0xff] }
0x14ac   :  { %v2685_v34 = vadd.f32 %v2679_v15, %v4626_v16  ;;  %v2694_v23 = vsel %vm231_vm0, %v2684_v48, 0.0 }
0x14ad   :  { %v2683_v43 = vadd.f32 %v2671_v32, %v4630_v19  ;;  %v2688_v61 = vsel %vm231_vm0, %v2682_v35, 0.0 }
0x14ae   :  { %2689 = vadd.xlane.f32.xlu0 %v2688_v61  ;;  %v2697_v26 = vsel %vm231_vm0, %v2685_v34, 0.0 }
0x14af   :  { %v2691_v33 = vsel %vm231_vm0, %v2683_v43, 0.0 }
0x14b0   :  { %2692 = vadd.xlane.f32.xlu1 %v2691_v33  ;;  %v4277_v33 = vld [vmem:[%s5309_s11 + $0x30] sm:$0xff]  }
0x14b1   :  { %3798 = vmatprep.subr.bf16.mxu1 %v4277_v33 }
0x14b2   :  { %2695 = vadd.xlane.f32.xlu0 %v2694_v23  ;;  %3799 = vmatpush3.bf16.msra.mxu1 %v4277_v33  ;;  %v3329_v23 = vld [vmem:[%s5308_s10] ss:$0 sm:$0xff] }
0x14b6   :  { %2698 = vadd.xlane.f32.xlu0 %v2697_v26 }
0x153b   :  { %v2690_v18 = vpop.xlane.xlu0 %2689 }
0x153c   :  { %v2701_v27 = vmul.f32 0.03125, %v2690_v18 }
0x153d   :  { %v2693_v20 = vpop.xlane.xlu1 %2692 }
0x153e   :  { %v5196_v21 = vsub.f32 %v2682_v35, %v2701_v27  ;;  %v2702_v19 = vmul.f32 0.03125, %v2693_v20 }
0x153f   :  { %v2696_v28 = vpop.xlane.xlu0 %2695 }
0x1540   :  { %v2706_v30 = vsub.f32 %v2683_v43, %v2702_v19  ;;  %v2703_v22 = vmul.f32 0.03125, %v2696_v28  ;;  %v2709_v17 = vmul.f32 %v5196_v21, %v5196_v21 }
0x1542   :  { %v5200_v31 = vsub.f32 %v2684_v48, %v2703_v22  ;;  %v2713_v16 = vsel %vm231_vm0, %v2709_v17, 0.0  ;;  %v2710_v3 = vmul.f32 %v2706_v30, %v2706_v30 }
0x1543   :  { %2714 = vadd.xlane.f32.xlu1 %v2713_v16  ;;  %v2699_v4 = vpop.xlane.xlu0 %2698 }
0x1544   :  { %v2704_v5 = vmul.f32 0.03125, %v2699_v4  ;;  %v2716_v24 = vsel %vm231_vm0, %v2710_v3, 0.0  ;;  %v2711_v7 = vmul.f32 %v5200_v31, %v5200_v31 }
0x1545   :  { %2717 = vadd.xlane.f32.xlu0 %v2716_v24 }
0x1546   :  { %v2708_v0 = vsub.f32 %v2685_v34, %v2704_v5  ;;  %v2719_v6 = vsel %vm231_vm0, %v2711_v7, 0.0  ;;  %v4278_v34 = vld [vmem:[%s5309_s11 + $0x38] sm:$0xff]   ;;  %v3334_v5 = vld [vmem:[%s5310_s12] ss:$0 sm:$0xff] }
0x1547   :  { %2720 = vadd.xlane.f32.xlu1 %v2719_v6  ;;  %3800 = vmatprep.subr.bf16.mxu1 %v4278_v34 }
0x1548   :  { %v2712_v62 = vmul.f32 %v2708_v0, %v2708_v0  ;;  %3801 = vmatpush3.bf16.msra.mxu1 %v4278_v34 }
0x154a   :  { %v2722_v8 = vsel %vm231_vm0, %v2712_v62, 0.0 }
0x154b   :  { %2723 = vadd.xlane.f32.xlu0 %v2722_v8 }
0x15d0   :  { %v2715_v41 = vpop.xlane.xlu1 %2714 }
0x15d1   :  { %v2725_v29 = vmul.f32 0.03125, %v2715_v41 }
0x15d2   :  { %v2718_v57 = vpop.xlane.xlu0 %2717 }
0x15d3   :  { %v2729_v45 = vadd.f32 1e-05, %v2725_v29  ;;  %v2726_v25 = vmul.f32 0.03125, %v2718_v57 }
0x15d4   :  { %v2721_v52 = vpop.xlane.xlu1 %2720 }
0x15d5   :  { %4409 = vrsqrt.f32 %v2729_v45  ;;  %v2730_v59 = vadd.f32 1e-05, %v2726_v25  ;;  %v2727_v58 = vmul.f32 0.03125, %v2721_v52 }
0x15d7   :  { %4411 = vrsqrt.f32 %v2730_v59  ;;  %v2731_v12 = vadd.f32 1e-05, %v2727_v58 }
0x15d8   :  { %v2724_v42 = vpop.xlane.xlu0 %2723 }
0x15d9   :  { %4413 = vrsqrt.f32 %v2731_v12  ;;  %v2728_v47 = vmul.f32 0.03125, %v2724_v42 }
0x15db   :  { %v2732_v53 = vadd.f32 1e-05, %v2728_v47 }
0x15dd   :  { %4415 = vrsqrt.f32 %v2732_v53 }
0x15df   :  { %v4410_v60 = vpop.eup %4409 }
0x15e0   :  { %v2737_v51 = vmul.f32 %v4410_v60, %v5196_v21 }
0x15e1   :  { %v4412_v46 = vpop.eup %4411 }
0x15e2   :  { %v2738_v63 = vmul.f32 %v4412_v46, %v2706_v30  ;;  %v2747_v11 = vmul.f32 %v3327_v1, %v2737_v51 }
0x15e3   :  { %v4414_v44 = vpop.eup %4413 }
0x15e4   :  { %v2739_v37 = vmul.f32 %v4414_v44, %v5200_v31  ;;  %v2748_v49 = vmul.f32 %v3327_v1, %v2738_v63  ;;  %v2757_v50 = vadd.f32 %v3328_v36, %v2747_v11 }
0x15e6   :  { %v2758_v54 = vadd.f32 %v3328_v36, %v2748_v49  ;;  %v2749_v13 = vmul.f32 %v3327_v1, %v2739_v37 }
0x15e7   :  { %v4416_v55 = vpop.eup %4415 }
0x15e8   :  { %v2740_v35 = vmul.f32 %v4416_v55, %v2708_v0  ;;  %v2761_v32 = vpack.c.bf16 %v2758_v54, %v2757_v50  ;;  %v2759_v15 = vadd.f32 %v3328_v36, %v2749_v13 }
0x15ea   :  { %v2750_v48 = vmul.f32 %v3327_v1, %v2740_v35  ;;  %3782 = vmatprep.mubr.msk.bf16.mxu0 %vm231_vm0, %v2761_v32 }
0x15ec   :  { %v2760_v43 = vadd.f32 %v3328_v36, %v2750_v48 }
0x15ee   :  { %v2762_v61 = vpack.c.bf16 %v2760_v43, %v2759_v15 }
0x15f0   :  { %3783 = vmatmul.mubr.msk.bf16.vlgmr.msra.gmra.mrb[32].mxu0 %vm231_vm0, %v2762_v61 }
0x16c3   :  { %v3784_v26 = vpop.f32.mrb[32].mxu0 }
0x16c4   :  { %v2835_v18 = vadd.f32 %v3784_v26, %v3329_v23  ;;  %v2826_v27 = vpop.f32.mrb[33].mxu0 }
0x16c5   :  { %v2827_v20 = vadd.f32 %v3329_v23, %v2826_v27  ;;  %v3785_v21 = vpop.f32.mrb[34].mxu0  ;;  %v3343_v27 = vld [vmem:[%s5311_s13] ss:$0 sm:$0xff] }
0x16c6   :  { %v2838_v19 = vadd.f32 %v3785_v21, %v3329_v23  ;;  %v2829_v28 = vpop.f32.mrb[35].mxu0  ;;  %v2843_v22 = vmax.f32 %v2835_v18, 0.0 }
0x16c7   :  { %v2830_v30 = vadd.f32 %v3329_v23, %v2829_v28  ;;  %v2841_v31 = vmax.f32 %v2827_v20, 0.0 }
0x16c8   :  { %v2844_v17 = vmax.f32 %v2838_v19, 0.0 }
0x16c9   :  { %v2842_v16 = vmax.f32 %v2830_v30, 0.0 }
0x16ca   :  { %v2846_v3 = vpack.c.bf16 %v2844_v17, %v2843_v22  ;;  %v3344_v22 = vld [vmem:[%s5312_s14] ss:$0 sm:$0xff] }
0x16cb   :  { %v2845_v4 = vpack.c.bf16 %v2842_v16, %v2841_v31 }
0x16cd   :  { %3802 = vmatprep.mubr.bf16.mxu1 %v2845_v4 }
0x16ce   :  { %3803 = vmatmul.mubr.bf16.vlgmr.msra.gmra.mrb[44].mxu1 %v2846_v3 }
0x17a1   :  { %v3804_v24 = vpop.f32.mrb[44].mxu1 }
0x17a2   :  { %v2952_v7 = vpop.f32.mrb[45].mxu1  ;;  %v2961_v0 = vadd.f32 %v3804_v24, %v3334_v5 }
0x17a3   :  { %v2953_v6 = vadd.f32 %v3334_v5, %v2952_v7  ;;  %v3805_v62 = vpop.f32.mrb[46].mxu1 }
0x17a4   :  { %v2955_v8 = vpop.f32.mrb[47].mxu1  ;;  %v2964_v9 = vadd.f32 %v3805_v62, %v3334_v5  ;;  %v2969_v56 = vadd.f32 %v2961_v0, %v2759_v15 }
0x17a5   :  { %v2967_v2 = vadd.f32 %v2953_v6, %v2757_v50  ;;  %v2956_v10 = vadd.f32 %v3334_v5, %v2955_v8  ;;  %v4483_v50 = vmov 0.0|0.0  }
0x17a6   :  { %v2970_v39 = vadd.f32 %v2964_v9, %v2760_v43  ;;  %v2979_v41 = vsel %vm231_vm0, %v2969_v56, 0.0  ;;  %3985 = vmatprep.subr.bf16.mxu0 %v4483_v50  ;;  %v4279_v9 = vld [vmem:[%s5313_s15] sm:$0xff]  }
0x17a7   :  { %v2968_v38 = vadd.f32 %v2956_v10, %v2758_v54  ;;  %v2973_v14 = vsel %vm231_vm0, %v2967_v2, 0.0  ;;  %v4485_v54 = vmov 0.0   ;;  %v4280_v10 = vld [vmem:[%s5313_s15 + $0x8] sm:$0xff]   ;;  %s4429_s15 = scalar_lea.vmem %s3203_s29, 64 }
0x17a8   :  { %2974 = vadd.xlane.f32.xlu1 %v2973_v14  ;;  %v2982_v29 = vsel %vm231_vm0, %v2970_v39, 0.0  ;;  %3814 = vmatprep.mubr.msk.f32.mxu0 %vm4484_vm9, %v4485_v54  ;;  %69 = vst.msk [vmem:[#allocation2] sm:$0xf] %vm68_vm10, %v4485_v54  ;;  %p4430_p0 = scmp.ne.s32.totalorder %s3203_s29, %s4429_s15  ;;  %p4435_p2 = scmp.lt.s32.totalorder %s4429_s15, %s4429_s15 }
0x17a9   :  { %v2976_v40 = vsel %vm231_vm0, %v2968_v38, 0.0 }
0x17aa   :  { %2977 = vadd.xlane.f32.xlu0 %v2976_v40  ;;  %p4436_p3 = por %p4435_p2, %p4434_p1 }
0x17ac   :  { %2980 = vadd.xlane.f32.xlu1 %v2979_v41  ;;  %p4437_p4 = pnand %p4436_p3, %p4430_p0 }
0x17ae   :  { %2983 = vadd.xlane.f32.xlu0 %v2982_v29  ;;  %v3346_v29 = vld [vmem:[%s5314_s16] ss:$0 sm:$0xff] }
0x1835   :  { %v2975_v57 = vpop.xlane.xlu1 %2974 }
0x1836   :  { %v2985_v45 = vmul.f32 0.03125, %v2975_v57 }
0x1837   :  { %v2978_v25 = vpop.xlane.xlu0 %2977 }
0x1838   :  { %v2989_v52 = vsub.f32 %v2967_v2, %v2985_v45  ;;  %v2986_v59 = vmul.f32 0.03125, %v2978_v25  ;;  %v3046_v2 = vld [vmem:[%s5316_s18] sm:$0xf] }
0x1839   :  { %v2981_v58 = vpop.xlane.xlu1 %2980 }
0x183a   :  { %v2990_v12 = vsub.f32 %v2968_v38, %v2986_v59  ;;  %v2987_v42 = vmul.f32 0.03125, %v2981_v58  ;;  %v2993_v47 = vmul.f32 %v2989_v52, %v2989_v52 }
0x183b   :  { %v2984_v53 = vpop.xlane.xlu0 %2983 }
0x183c   :  { %v2991_v60 = vsub.f32 %v2969_v56, %v2987_v42  ;;  %v2988_v1 = vmul.f32 0.03125, %v2984_v53  ;;  %v2997_v51 = vsel %vm231_vm0, %v2993_v47, 0.0  ;;  %v2994_v46 = vmul.f32 %v2990_v12, %v2990_v12  ;;  %v3045_v56 = vld [vmem:[#allocation2] sm:$0xf] }
0x183d   :  { %2998 = vadd.xlane.f32.xlu1 %v2997_v51 }
0x183e   :  { %v2992_v63 = vsub.f32 %v2970_v39, %v2988_v1  ;;  %v3000_v11 = vsel %vm231_vm0, %v2994_v46, 0.0  ;;  %v2995_v44 = vmul.f32 %v2991_v60, %v2991_v60 }
0x183f   :  { %3001 = vadd.xlane.f32.xlu0 %v3000_v11 }
0x1840   :  { %v3003_v36 = vsel %vm231_vm0, %v2995_v44, 0.0  ;;  %v2996_v37 = vmul.f32 %v2992_v63, %v2992_v63 }
0x1841   :  { %3004 = vadd.xlane.f32.xlu1 %v3003_v36 }
0x1842   :  { %v3006_v49 = vsel %vm231_vm0, %v2996_v37, 0.0 }
0x1843   :  { %3007 = vadd.xlane.f32.xlu0 %v3006_v49 }
0x18ca   :  { %v2999_v55 = vpop.xlane.xlu1 %2998 }
0x18cb   :  { %v3009_v13 = vmul.f32 0.03125, %v2999_v55 }
0x18cc   :  { %v3002_v35 = vpop.xlane.xlu0 %3001 }
0x18cd   :  { %v3013_v32 = vadd.f32 1e-05, %v3009_v13  ;;  %v3010_v48 = vmul.f32 0.03125, %v3002_v35 }
0x18ce   :  { %v3005_v15 = vpop.xlane.xlu1 %3004 }
0x18cf   :  { %4417 = vrsqrt.f32 %v3013_v32  ;;  %v3014_v43 = vadd.f32 1e-05, %v3010_v48  ;;  %v3011_v61 = vmul.f32 0.03125, %v3005_v15 }
0x18d0   :  { %v3008_v33 = vpop.xlane.xlu0 %3007 }
0x18d1   :  { %4419 = vrsqrt.f32 %v3014_v43  ;;  %v3015_v34 = vadd.f32 1e-05, %v3011_v61  ;;  %v3012_v23 = vmul.f32 0.03125, %v3008_v33 }
0x18d3   :  { %4421 = vrsqrt.f32 %v3015_v34  ;;  %v3016_v26 = vadd.f32 1e-05, %v3012_v23 }
0x18d5   :  { %4423 = vrsqrt.f32 %v3016_v26 }
0x18d9   :  { %v4418_v18 = vpop.eup %4417 }
0x18da   :  { %v3021_v20 = vmul.f32 %v4418_v18, %v2989_v52 }
0x18db   :  { %v4420_v21 = vpop.eup %4419 }
0x18dc   :  { %v3022_v19 = vmul.f32 %v4420_v21, %v2990_v12  ;;  %v3031_v28 = vmul.f32 %v3343_v27, %v3021_v20 }
0x18dd   :  { %v4422_v30 = vpop.eup %4421 }
0x18de   :  { %v3023_v17 = vmul.f32 %v4422_v30, %v2991_v60  ;;  %v3032_v31 = vmul.f32 %v3343_v27, %v3022_v19  ;;  %v3041_v4 = vadd.f32 %v3344_v22, %v3031_v28 }
0x18df   :  { %v4424_v16 = vpop.eup %4423 }
0x18e0   :  { %v3024_v3 = vmul.f32 %v4424_v16, %v2992_v63  ;;  %v3042_v5 = vadd.f32 %v3344_v22, %v3032_v31  ;;  %v3033_v24 = vmul.f32 %v3343_v27, %v3023_v17 }
0x18e2   :  { %v3986_v7 = vpack.c.bf16 %v3042_v5, %v3041_v4  ;;  %v3034_v0 = vmul.f32 %v3343_v27, %v3024_v3  ;;  %v3043_v6 = vadd.f32 %v3344_v22, %v3033_v24 }
0x18e4   :  { %3987 = vmatpush3.bf16.msra.mxu0 %v3986_v7  ;;  %v3044_v62 = vadd.f32 %v3344_v22, %v3034_v0 }
0x18e5   :  { %3988 = vmatprep.subr.bf16.mxu0 %v4483_v50 }
0x18e6   :  { %v3989_v8 = vpack.c.bf16 %v3044_v62, %v3043_v6 }
0x18e8   :  { %3990 = vmatpush3.bf16.msra.mxu0 %v3989_v8 }
0x18e9   :  { %3817 = vmatprep.subr.bf16.mxu0 %v4485_v54 }
0x18eb   :  { %3815 = vmatmul.mubr.msk.f32.vlgmr.msra.gmra.mrb[36].mxu0 %vm231_vm0, %v3046_v2 }
0x18ec   :  { %3821 = vmatprep.mubr.msk.bf16.mxu0 %vm4484_vm9, %v4485_v54  ;;  %3818 = vmatpush3.bf16.msra.mxu0 %v4279_v9 }
0x18ed   :  { %3819 = vmatprep.subr.bf16.mxu0 %v4485_v54 }
0x18f0   :  { %3820 = vmatpush3.bf16.msra.mxu0 %v4280_v10 }
0x19be   :  { %v3116_v38 = vpop.f32.mrb[36].mxu0 }
0x19bf   :  { %v3120_v14 = vadd.f32 %v3116_v38, %v3045_v56  ;;  %v3816_v39 = vpop.f32.mrb[37].mxu0 }
0x19c1   :  { %3122 = vst.msk [vmem:[#allocation2] sm:$0xf] %vm68_vm10, %v3120_v14 }
0x19c8   :  { %v3126_v40 = vld [vmem:[#allocation2] sm:$0xf] }
0x19c9   :  { %v3127_v41 = vpack.c.bf16 %v3126_v40, %v3126_v40 }
0x19cb   :  { %3822 = vmatmul.mubr.msk.bf16.vlgmr.msra.gmra.mrb[40].mxu0 %vm231_vm0, %v3127_v41 }
0x1a9e   :  { %v3188_v57 = vpop.f32.mrb[40].mxu0 }
0x1a9f   :  { %v3189_v45 = vadd.f32 %v3346_v29, %v3188_v57  ;;  %v3823_v25 = vpop.f32.mrb[41].mxu0 }
0x1aa0   :  { %v3191_v52 = vpop.f32.mrb[42].mxu0 }
0x1aa1   :  { %v3824_v59 = vpop.f32.mrb[43].mxu0  ;;  %3195 = vst.msk [vmem:[#allocation3] sm:$0xf] %vm3194_vm11, %v3189_v45 }
0x1aa2   :  { %4440 = shalt.err (!%p4437_p4)
}
0x1aa3   :  { %s4441_s16 = scalar_lea.hbm %s5317_s19, 64 }
0x1aa4   :  { %p4442_p5 = scmp.ne.s32.totalorder %s5317_s19, %s4441_s16  ;;  %p4445_p6 = scmp.lt.u32.totalorder %s4441_s16, %s5317_s19 }
0x1aa6   :  { %p4447_p7 = pnand %p4445_p6, %p4442_p5 }
0x1aa8   :  { %4450 = shalt.err (!%p4447_p7)
}
0x1aa9   :  { %3205 = dma.vmem_to_hbm [thread:$0]  %s3203_s29, 64, %s5317_s19, [#allocation4]  }
0x1aaa   :  { %4451 = dma.done.wait [#allocation4], 64  }
0x1aab   :  { %4452 = vsyncadd [#allocation4], 4294967232 }
0x1aac   :  { %3209 = vsyncpa [#allocation4], 1 }

</bundles_post_ra>
